<compile_context>
chip_gen: v5e
topology: v5e:2x2
jax: 0.10.0
libtpu: 0.0.40
codegen_flags: <defaults>
</compile_context>

<pallas_src>
import functools

import jax
import jax.numpy as jnp
from jax.experimental import pallas as pl
from jax.experimental.pallas import tpu as pltpu


def _build_w_toeplitz(w_hwio, width):
    """Fold the kw taps + 'same' W-padding of a KxK conv into K block-Toeplitz
    matrices T[kh] of shape (width*Cin, width*Cout), so that

        out[h, w*Cout + co] = sum_kh  x[h + kh - P, :] @ T[kh]

    with x laid out as (H, width*Cin) and rows outside [0, H) treated as zero.
    Returned stacked as (K, width*Cin, width*Cout).
    """
    K, _, Cin, Cout = w_hwio.shape
    P = K // 2
    kw = jnp.arange(width)[:, None] - jnp.arange(width)[None, :] + P  # (w_in, w_out)
    valid = (kw >= 0) & (kw < K)
    g = w_hwio[:, jnp.clip(kw, 0, K - 1)]                  # (K, W_in, W_out, Cin, Cout)
    g = jnp.where(valid[None, :, :, None, None], g, 0.0)
    g = jnp.transpose(g, (0, 1, 3, 2, 4))                  # (K, W_in, Cin, W_out, Cout)
    return g.reshape(K, width * Cin, width * Cout)


def basic_block_kernel(x_ref, t1_ref, b1_ref, t2_ref, b2_ref, o_ref, lhs_ref, *,
                       K, Nb, H, W, Cin, Cout, scaling_factor, compute_dtype):
    """Fused BasicBlock forward for Nb batch elements (lane-dense layout).

    x_ref  : (Nb, H, W*Cin)          input slab (f32)
    t1_ref : (K*W*Cin, W*Cout)       conv1 concatenated block-Toeplitz weights
    b1_ref : (1, W*Cout)             conv1 bias tiled along W (f32)
    t2_ref : (K*W*Cout, W*Cout)      conv2 concatenated block-Toeplitz weights
    b2_ref : (1, W*Cout)             conv2 bias tiled along W
    o_ref  : (Nb, H, W*Cout)         output slab
    lhs_ref: (Nb*H, K*W*Cout) VMEM   shifted-window LHS scratch (reused by both convs)
    """
    P = K // 2
    WCi = W * Cin
    WCo = W * Cout

    # ---- build conv1 LHS: lhs[b*H+h, kh*WCi:(kh+1)*WCi] = x[b, h+kh-P, :]
    #      (rows outside [0,H) are zero; W-border zeros live in the weights)
    for b in range(Nb):
        xc = x_ref[b].astype(compute_dtype)                # single cast per element
        for kh in range(K):
            lo = max(0, P - kh)
            hi = min(H, H + P - kh)
            col = slice(kh * WCi, (kh + 1) * WCi)          # lane-aligned (multiple of 128)
            if lo > 0:
                lhs_ref[b * H: b * H + lo, col] = jnp.zeros((lo, WCi), compute_dtype)
            if hi < H:
                lhs_ref[b * H + hi: b * H + H, col] = jnp.zeros((H - hi, WCi), compute_dtype)
            lhs_ref[b * H + lo: b * H + hi, col] = xc[lo + kh - P: hi + kh - P, :]

    # ---- conv1: one MXU dot, contraction depth K*W*Cin, f32 accumulation
    acc1 = jnp.dot(lhs_ref[...], t1_ref[...], preferred_element_type=jnp.float32)
    y1 = jnp.maximum(acc1 + b1_ref[...], 0.0)              # (Nb*H, W*Cout) f32

    # ---- build conv2 LHS from conv1 output (reuse the same scratch; Cin==Cout)
    y1c = y1.astype(compute_dtype)
    for b in range(Nb):
        for kh in range(K):
            lo = max(0, P - kh)
            hi = min(H, H + P - kh)
            col = slice(kh * WCo, (kh + 1) * WCo)
            if lo > 0:
                lhs_ref[b * H: b * H + lo, col] = jnp.zeros((lo, WCo), compute_dtype)
            if hi < H:
                lhs_ref[b * H + hi: b * H + H, col] = jnp.zeros((H - hi, WCo), compute_dtype)
            lhs_ref[b * H + lo: b * H + hi, col] = \
                y1c[b * H + lo + kh - P: b * H + hi + kh - P, :]

    # ---- conv2
    acc2 = jnp.dot(lhs_ref[...], t2_ref[...], preferred_element_type=jnp.float32)
    y2 = jnp.maximum(acc2 + b2_ref[...], 0.0)              # (Nb*H, W*Cout) f32

    # ---- identity residual (stride==1, Cin==Cout) + last ReLU, per element
    for b in range(Nb):
        res = x_ref[b].astype(jnp.float32)
        if scaling_factor != 1.0:                          # static Python branch
            res = res * scaling_factor
        o_ref[b] = jnp.maximum(y2[b * H:(b + 1) * H, :] + res, 0.0).astype(o_ref.dtype)


def basic_block_forward(x, w1, b1, w2, b2, *, K, scaling_factor=1.0,
                        mxu_dtype=jnp.bfloat16, data_format="NCHW",
                        batch_block=None):
    """BasicBlock forward.

    x: (N, C, H, W) if data_format == "NCHW" (module semantics), or
       (N, H, W, C) if data_format == "NHWC" (no wrapper transposes).
    w1/w2: HWIO (K, K, Cin, Cout); b1/b2: (Cout,).
    """
    if data_format == "NCHW":
        N, Cin, H, W = x.shape
        x_nhwc = jnp.transpose(x, (0, 2, 3, 1))   # one HBM round trip forced by NCHW API
    else:
        N, H, W, Cin = x.shape
        x_nhwc = x
    Cout = w1.shape[-1]
    assert Cin == Cout, "identity residual requires in_channels == out_channels"
    WCi, WCo = W * Cin, W * Cout
    assert WCi % 128 == 0 and WCo % 128 == 0, \
        "lane-dense layout requires W*C to be a multiple of 128"
    assert H % 8 == 0, "H must be a multiple of 8 for (8,128)-tiled slabs"

    x_flat = x_nhwc.reshape(N, H, WCi)            # free reshape (lane-dense slabs)

    # ---- choose batch-block size: flatten (Nb, H) into the matmul M dimension.
    if batch_block is None:
        rows_target = 256                          # keeps f32 accumulators well under vreg file
        nb_max = max(1, rows_target // H)
        Nb = 1
        for d in range(1, min(N, nb_max) + 1):
            if N % d == 0:
                Nb = d
        # TODO(synk): on v7x prefer >= 2 grid steps (2 TensorCores) when N allows it
        # without dropping Nb*H below ~128.
    else:
        Nb = int(batch_block)
        assert N % Nb == 0
    steps = N // Nb

    # ---- one-time weight preprocessing: fold kw taps + W 'same'-padding, then
    #      concatenate the K row taps along the contraction dim.
    t1 = _build_w_toeplitz(w1, W).reshape(K * WCi, WCo).astype(mxu_dtype)
    t2 = _build_w_toeplitz(w2, W).reshape(K * WCo, WCo).astype(mxu_dtype)
    b1_row = jnp.tile(b1, W).reshape(1, WCo).astype(jnp.float32)
    b2_row = jnp.tile(b2, W).reshape(1, WCo).astype(jnp.float32)

    kernel = functools.partial(
        basic_block_kernel, K=K, Nb=Nb, H=H, W=W, Cin=Cin, Cout=Cout,
        scaling_factor=float(scaling_factor), compute_dtype=mxu_dtype)

    # ---- generation-aware VMEM budget.
    try:
        phys_vmem = int(pltpu.get_tpu_info().vmem_capacity_bytes)
    except Exception:
        phys_vmem = 64 << 20                      # conservative (v7x per-core VMEM)
    cap = max(8 << 20, (phys_vmem * 3) // 4)
    itemsize = jnp.dtype(mxu_dtype).itemsize
    est = (2 * Nb * H * (WCi + WCo) * 4           # double-buffered in/out slabs (f32)
           + 2 * (t1.size + t2.size) * itemsize   # weights (worst case double-buffered)
           + 4 * WCo * 4                          # biases
           + Nb * H * K * WCo * itemsize)         # LHS scratch
    vmem_limit = int(min(max(2 * est, 8 << 20), cap))

    def _run(single_buffer_consts):
        def const_spec(shape):
            idx = lambda b, _n=len(shape): (0,) * _n
            if single_buffer_consts:
                # Grid-invariant operands don't need double buffering.
                return pl.BlockSpec(shape, idx, pipeline_mode=pl.Buffered(1))
            return pl.BlockSpec(shape, idx)

        return pl.pallas_call(
            kernel,
            out_shape=jax.ShapeDtypeStruct((N, H, WCo), x.dtype),
            grid_spec=pltpu.PrefetchScalarGridSpec(
                num_scalar_prefetch=0,
                grid=(steps,),
                in_specs=[
                    # TODO(synk): raise to pipeline_mode=pl.Buffered(3) if xprof
                    # shows exposed input DMA at large per-step slabs.
                    pl.BlockSpec((Nb, H, WCi), lambda b: (b, 0, 0)),
                    const_spec((K * WCi, WCo)),
                    const_spec((1, WCo)),
                    const_spec((K * WCo, WCo)),
                    const_spec((1, WCo)),
                ],
                out_specs=pl.BlockSpec((Nb, H, WCo), lambda b: (b, 0, 0)),
                scratch_shapes=[pltpu.VMEM((Nb * H, K * WCo), mxu_dtype)],
            ),
            compiler_params=pltpu.CompilerParams(
                dimension_semantics=("parallel",),
                vmem_limit_bytes=vmem_limit),
        )(x_flat, t1, b1_row, t2, b2_row)

    try:
        out_flat = _run(hasattr(pl, "Buffered"))
    except Exception:
        out_flat = _run(False)                    # fall back to default double buffering

    out_nhwc = out_flat.reshape(N, H, W, Cout)
    if data_format == "NCHW":
        return jnp.transpose(out_nhwc, (0, 3, 1, 2))
    return out_nhwc


def _reference_forward(x_nchw, w1, b1, w2, b2, *, scaling_factor=1.0):
    """Pure-JAX reference (lax.conv) for sanity checking."""
    dn = ('NHWC', 'HWIO', 'NHWC')
    x = jnp.transpose(x_nchw, (0, 2, 3, 1))
    y = jax.lax.conv_general_dilated(x, w1, (1, 1), 'SAME',
                                     dimension_numbers=dn) + b1
    y = jnp.maximum(y, 0.0)
    y2 = jax.lax.conv_general_dilated(y, w2, (1, 1), 'SAME',
                                      dimension_numbers=dn) + b2
    y2 = jnp.maximum(y2, 0.0)
    out = jnp.maximum(y2 + x * scaling_factor, 0.0)
    return jnp.transpose(out, (0, 3, 1, 2))


if __name__ == "__main__":
    # Small shapes consistent with BasicBlock(C, C, 3) default config.
    # W * C = 128 -> lane-dense slabs; Nb*H = 32 rows per grid step.
    N, C, H, W, K = 2, 8, 16, 16, 3
    scaling_factor = 1.0

    key = jax.random.PRNGKey(0)
    kx, kw1, kb1, kw2, kb2 = jax.random.split(key, 5)

    x = jax.random.normal(kx, (N, C, H, W), dtype=jnp.float32)

    # Deterministic kaiming_normal_-style init (fan_in = C*K*K), HWIO layout.
    fan_in = C * K * K
    std = (2.0 / fan_in) ** 0.5
    w1 = jax.random.normal(kw1, (K, K, C, C), dtype=jnp.float32) * std
    w2 = jax.random.normal(kw2, (K, K, C, C), dtype=jnp.float32) * std
    bound = 1.0 / (fan_in ** 0.5)
    b1 = jax.random.uniform(kb1, (C,), jnp.float32, -bound, bound)
    b2 = jax.random.uniform(kb2, (C,), jnp.float32, -bound, bound)

    ref = _reference_forward(x, w1, b1, w2, b2, scaling_factor=scaling_factor)

    # Exact path (f32 on the MXU) -- tight tolerance.
    out_f32 = basic_block_forward(x, w1, b1, w2, b2, K=K,
                                  scaling_factor=scaling_factor,
                                  mxu_dtype=jnp.float32)
    out_f32 = jax.block_until_ready(out_f32)
    assert out_f32.shape == (N, C, H, W)
    assert jnp.allclose(out_f32, ref, atol=1e-4, rtol=1e-4)

    # bf16 MXU path (v6e/v7x throughput path) -- looser tolerance
    # (both convs run with bf16 operands, f32 accumulation).
    out_bf16 = basic_block_forward(x, w1, b1, w2, b2, K=K,
                                   scaling_factor=scaling_factor,
                                   mxu_dtype=jnp.bfloat16)
    out_bf16 = jax.block_until_ready(out_bf16)
    assert out_bf16.shape == (N, C, H, W)
    assert jnp.allclose(out_bf16, ref, atol=5e-2, rtol=5e-2)

    # NHWC fast path: no layout transposes around the pallas_call.
    x_nhwc = jnp.transpose(x, (0, 2, 3, 1))
    out_nhwc = basic_block_forward(x_nhwc, w1, b1, w2, b2, K=K,
                                   scaling_factor=scaling_factor,
                                   mxu_dtype=jnp.bfloat16, data_format="NHWC")
    out_nhwc = jax.block_until_ready(out_nhwc)
    assert out_nhwc.shape == (N, H, W, C)
    assert jnp.allclose(out_nhwc, jnp.transpose(ref, (0, 2, 3, 1)),
                        atol=5e-2, rtol=5e-2)

    print("KERNEL_OK")
</pallas_src>

<mosaic_0001>
module attributes {stable_mosaic.version = 11 : i64} {
  func.func @basic_block_kernel(%arg0: i32, %arg1: memref<2x16x128xf32, #tpu.memory_space<vmem>>, %arg2: memref<384x128xf32, #tpu.memory_space<vmem>>, %arg3: memref<1x128xf32, #tpu.memory_space<vmem>>, %arg4: memref<384x128xf32, #tpu.memory_space<vmem>>, %arg5: memref<1x128xf32, #tpu.memory_space<vmem>>, %arg6: memref<2x16x128xf32, #tpu.memory_space<vmem>>, %arg7: memref<32x384xf32, #tpu.memory_space<vmem>>) attributes {dimension_semantics = [#tpu.dimension_semantics<parallel>], iteration_bounds = array<i64: 1>, scalar_prefetch = 0 : i64, scratch_operands = 1 : i64, tpu.core_type = #tpu.core_type<tc>, window_params = [{transform_indices = @transform_0, window_bounds = array<i64: 2, 16, 128>}, {pipeline_mode = #tpu.pipeline_mode<synchronous>, transform_indices = @transform_1, window_bounds = array<i64: 384, 128>}, {pipeline_mode = #tpu.pipeline_mode<synchronous>, transform_indices = @transform_2, window_bounds = array<i64: 1, 128>}, {pipeline_mode = #tpu.pipeline_mode<synchronous>, transform_indices = @transform_3, window_bounds = array<i64: 384, 128>}, {pipeline_mode = #tpu.pipeline_mode<synchronous>, transform_indices = @transform_4, window_bounds = array<i64: 1, 128>}, {transform_indices = @transform_5, window_bounds = array<i64: 2, 16, 128>}]} {
    %c0 = arith.constant 0 : index
    %c0_0 = arith.constant 0 : index
    %c0_1 = arith.constant 0 : index
    %0 = vector.load %arg1[%c0, %c0_0, %c0_1] : memref<2x16x128xf32, #tpu.memory_space<vmem>>, vector<1x16x128xf32>
    %1 = vector.shape_cast %0 : vector<1x16x128xf32> to vector<16x128xf32>
    %cst = arith.constant 0.000000e+00 : f32
    %2 = vector.broadcast %cst : f32 to vector<1x128xf32>
    %c0_2 = arith.constant 0 : index
    %c0_3 = arith.constant 0 : index
    %3 = vector.load %arg7[%c0_2, %c0_3] : memref<32x384xf32, #tpu.memory_space<vmem>>, vector<1x128xf32>
    tpu.vector_store %arg7[%c0_2, %c0_3], %2 {strides = array<i32>} : memref<32x384xf32, #tpu.memory_space<vmem>>, vector<1x128xf32>,
    %4 = vector.extract_strided_slice %1 {offsets = [0, 0], sizes = [15, 128], strides = [1, 1]} : vector<16x128xf32> to vector<15x128xf32>
    %c1 = arith.constant 1 : index
    %c0_4 = arith.constant 0 : index
    %5 = vector.load %arg7[%c1, %c0_4] : memref<32x384xf32, #tpu.memory_space<vmem>>, vector<15x128xf32>
    tpu.vector_store %arg7[%c1, %c0_4], %4 {strides = array<i32>} : memref<32x384xf32, #tpu.memory_space<vmem>>, vector<15x128xf32>,
    %c0_5 = arith.constant 0 : index
    %c128 = arith.constant 128 : index
    %6 = vector.load %arg7[%c0_5, %c128] : memref<32x384xf32, #tpu.memory_space<vmem>>, vector<16x128xf32>
    tpu.vector_store %arg7[%c0_5, %c128], %1 {strides = array<i32>} : memref<32x384xf32, #tpu.memory_space<vmem>>, vector<16x128xf32>,
    %cst_6 = arith.constant 0.000000e+00 : f32
    %7 = vector.broadcast %cst_6 : f32 to vector<1x128xf32>
    %c15 = arith.constant 15 : index
    %c256 = arith.constant 256 : index
    %8 = vector.load %arg7[%c15, %c256] : memref<32x384xf32, #tpu.memory_space<vmem>>, vector<1x128xf32>
    tpu.vector_store %arg7[%c15, %c256], %7 {strides = array<i32>} : memref<32x384xf32, #tpu.memory_space<vmem>>, vector<1x128xf32>,
    %9 = vector.extract_strided_slice %1 {offsets = [1, 0], sizes = [15, 128], strides = [1, 1]} : vector<16x128xf32> to vector<15x128xf32>
    %c0_7 = arith.constant 0 : index
    %c256_8 = arith.constant 256 : index
    %10 = vector.load %arg7[%c0_7, %c256_8] : memref<32x384xf32, #tpu.memory_space<vmem>>, vector<15x128xf32>
    tpu.vector_store %arg7[%c0_7, %c256_8], %9 {strides = array<i32>} : memref<32x384xf32, #tpu.memory_space<vmem>>, vector<15x128xf32>,
    %c1_9 = arith.constant 1 : index
    %c0_10 = arith.constant 0 : index
    %c0_11 = arith.constant 0 : index
    %11 = vector.load %arg1[%c1_9, %c0_10, %c0_11] : memref<2x16x128xf32, #tpu.memory_space<vmem>>, vector<1x16x128xf32>
    %12 = vector.shape_cast %11 : vector<1x16x128xf32> to vector<16x128xf32>
    %cst_12 = arith.constant 0.000000e+00 : f32
    %13 = vector.broadcast %cst_12 : f32 to vector<1x128xf32>
    %c16 = arith.constant 16 : index
    %c0_13 = arith.constant 0 : index
    %14 = vector.load %arg7[%c16, %c0_13] : memref<32x384xf32, #tpu.memory_space<vmem>>, vector<1x128xf32>
    tpu.vector_store %arg7[%c16, %c0_13], %13 {strides = array<i32>} : memref<32x384xf32, #tpu.memory_space<vmem>>, vector<1x128xf32>,
    %15 = vector.extract_strided_slice %12 {offsets = [0, 0], sizes = [15, 128], strides = [1, 1]} : vector<16x128xf32> to vector<15x128xf32>
    %c17 = arith.constant 17 : index
    %c0_14 = arith.constant 0 : index
    %16 = vector.load %arg7[%c17, %c0_14] : memref<32x384xf32, #tpu.memory_space<vmem>>, vector<15x128xf32>
    tpu.vector_store %arg7[%c17, %c0_14], %15 {strides = array<i32>} : memref<32x384xf32, #tpu.memory_space<vmem>>, vector<15x128xf32>,
    %c16_15 = arith.constant 16 : index
    %c128_16 = arith.constant 128 : index
    %17 = vector.load %arg7[%c16_15, %c128_16] : memref<32x384xf32, #tpu.memory_space<vmem>>, vector<16x128xf32>
    tpu.vector_store %arg7[%c16_15, %c128_16], %12 {strides = array<i32>} : memref<32x384xf32, #tpu.memory_space<vmem>>, vector<16x128xf32>,
    %cst_17 = arith.constant 0.000000e+00 : f32
    %18 = vector.broadcast %cst_17 : f32 to vector<1x128xf32>
    %c31 = arith.constant 31 : index
    %c256_18 = arith.constant 256 : index
    %19 = vector.load %arg7[%c31, %c256_18] : memref<32x384xf32, #tpu.memory_space<vmem>>, vector<1x128xf32>
    tpu.vector_store %arg7[%c31, %c256_18], %18 {strides = array<i32>} : memref<32x384xf32, #tpu.memory_space<vmem>>, vector<1x128xf32>,
    %20 = vector.extract_strided_slice %12 {offsets = [1, 0], sizes = [15, 128], strides = [1, 1]} : vector<16x128xf32> to vector<15x128xf32>
    %c16_19 = arith.constant 16 : index
    %c256_20 = arith.constant 256 : index
    %21 = vector.load %arg7[%c16_19, %c256_20] : memref<32x384xf32, #tpu.memory_space<vmem>>, vector<15x128xf32>
    tpu.vector_store %arg7[%c16_19, %c256_20], %20 {strides = array<i32>} : memref<32x384xf32, #tpu.memory_space<vmem>>, vector<15x128xf32>,
    %c0_21 = arith.constant 0 : index
    %c0_22 = arith.constant 0 : index
    %22 = vector.load %arg7[%c0_21, %c0_22] : memref<32x384xf32, #tpu.memory_space<vmem>>, vector<32x384xf32>
    %c0_23 = arith.constant 0 : index
    %c0_24 = arith.constant 0 : index
    %23 = vector.load %arg2[%c0_23, %c0_24] : memref<384x128xf32, #tpu.memory_space<vmem>>, vector<384x128xf32>
    %cst_25 = arith.constant dense<0.000000e+00> : vector<32x128xf32>
    %24 = tpu.matmul %22, %23, %cst_25 {dimension_numbers = #tpu.dot_dimension_numbers<[1], [0], [0], [1], [0, 0, 1, 1], [], []>} : vector<32x384xf32>, vector<384x128xf32>, vector<32x128xf32> -> vector<32x128xf32>
    %c0_26 = arith.constant 0 : index
    %c0_27 = arith.constant 0 : index
    %25 = vector.load %arg3[%c0_26, %c0_27] : memref<1x128xf32, #tpu.memory_space<vmem>>, vector<1x128xf32>
    %26 = vector.broadcast %25 : vector<1x128xf32> to vector<32x128xf32>
    %27 = arith.addf %24, %26 : vector<32x128xf32>
    %cst_28 = arith.constant 0.000000e+00 : f32
    %28 = vector.broadcast %cst_28 : f32 to vector<32x128xf32>
    %29 = arith.maximumf %27, %28 : vector<32x128xf32>
    %cst_29 = arith.constant 0.000000e+00 : f32
    %30 = vector.broadcast %cst_29 : f32 to vector<1x128xf32>
    %c0_30 = arith.constant 0 : index
    %c0_31 = arith.constant 0 : index
    %31 = vector.load %arg7[%c0_30, %c0_31] : memref<32x384xf32, #tpu.memory_space<vmem>>, vector<1x128xf32>
    tpu.vector_store %arg7[%c0_30, %c0_31], %30 {strides = array<i32>} : memref<32x384xf32, #tpu.memory_space<vmem>>, vector<1x128xf32>,
    %32 = vector.extract_strided_slice %29 {offsets = [0, 0], sizes = [15, 128], strides = [1, 1]} : vector<32x128xf32> to vector<15x128xf32>
    %c1_32 = arith.constant 1 : index
    %c0_33 = arith.constant 0 : index
    %33 = vector.load %arg7[%c1_32, %c0_33] : memref<32x384xf32, #tpu.memory_space<vmem>>, vector<15x128xf32>
    tpu.vector_store %arg7[%c1_32, %c0_33], %32 {strides = array<i32>} : memref<32x384xf32, #tpu.memory_space<vmem>>, vector<15x128xf32>,
    %34 = vector.extract_strided_slice %29 {offsets = [0, 0], sizes = [16, 128], strides = [1, 1]} : vector<32x128xf32> to vector<16x128xf32>
    %c0_34 = arith.constant 0 : index
    %c128_35 = arith.constant 128 : index
    %35 = vector.load %arg7[%c0_34, %c128_35] : memref<32x384xf32, #tpu.memory_space<vmem>>, vector<16x128xf32>
    tpu.vector_store %arg7[%c0_34, %c128_35], %34 {strides = array<i32>} : memref<32x384xf32, #tpu.memory_space<vmem>>, vector<16x128xf32>,
    %cst_36 = arith.constant 0.000000e+00 : f32
    %36 = vector.broadcast %cst_36 : f32 to vector<1x128xf32>
    %c15_37 = arith.constant 15 : index
    %c256_38 = arith.constant 256 : index
    %37 = vector.load %arg7[%c15_37, %c256_38] : memref<32x384xf32, #tpu.memory_space<vmem>>, vector<1x128xf32>
    tpu.vector_store %arg7[%c15_37, %c256_38], %36 {strides = array<i32>} : memref<32x384xf32, #tpu.memory_space<vmem>>, vector<1x128xf32>,
    %38 = vector.extract_strided_slice %29 {offsets = [1, 0], sizes = [15, 128], strides = [1, 1]} : vector<32x128xf32> to vector<15x128xf32>
    %c0_39 = arith.constant 0 : index
    %c256_40 = arith.constant 256 : index
    %39 = vector.load %arg7[%c0_39, %c256_40] : memref<32x384xf32, #tpu.memory_space<vmem>>, vector<15x128xf32>
    tpu.vector_store %arg7[%c0_39, %c256_40], %38 {strides = array<i32>} : memref<32x384xf32, #tpu.memory_space<vmem>>, vector<15x128xf32>,
    %cst_41 = arith.constant 0.000000e+00 : f32
    %40 = vector.broadcast %cst_41 : f32 to vector<1x128xf32>
    %c16_42 = arith.constant 16 : index
    %c0_43 = arith.constant 0 : index
    %41 = vector.load %arg7[%c16_42, %c0_43] : memref<32x384xf32, #tpu.memory_space<vmem>>, vector<1x128xf32>
    tpu.vector_store %arg7[%c16_42, %c0_43], %40 {strides = array<i32>} : memref<32x384xf32, #tpu.memory_space<vmem>>, vector<1x128xf32>,
    %42 = vector.extract_strided_slice %29 {offsets = [16, 0], sizes = [15, 128], strides = [1, 1]} : vector<32x128xf32> to vector<15x128xf32>
    %c17_44 = arith.constant 17 : index
    %c0_45 = arith.constant 0 : index
    %43 = vector.load %arg7[%c17_44, %c0_45] : memref<32x384xf32, #tpu.memory_space<vmem>>, vector<15x128xf32>
    tpu.vector_store %arg7[%c17_44, %c0_45], %42 {strides = array<i32>} : memref<32x384xf32, #tpu.memory_space<vmem>>, vector<15x128xf32>,
    %44 = vector.extract_strided_slice %29 {offsets = [16, 0], sizes = [16, 128], strides = [1, 1]} : vector<32x128xf32> to vector<16x128xf32>
    %c16_46 = arith.constant 16 : index
    %c128_47 = arith.constant 128 : index
    %45 = vector.load %arg7[%c16_46, %c128_47] : memref<32x384xf32, #tpu.memory_space<vmem>>, vector<16x128xf32>
    tpu.vector_store %arg7[%c16_46, %c128_47], %44 {strides = array<i32>} : memref<32x384xf32, #tpu.memory_space<vmem>>, vector<16x128xf32>,
    %cst_48 = arith.constant 0.000000e+00 : f32
    %46 = vector.broadcast %cst_48 : f32 to vector<1x128xf32>
    %c31_49 = arith.constant 31 : index
    %c256_50 = arith.constant 256 : index
    %47 = vector.load %arg7[%c31_49, %c256_50] : memref<32x384xf32, #tpu.memory_space<vmem>>, vector<1x128xf32>
    tpu.vector_store %arg7[%c31_49, %c256_50], %46 {strides = array<i32>} : memref<32x384xf32, #tpu.memory_space<vmem>>, vector<1x128xf32>,
    %48 = vector.extract_strided_slice %29 {offsets = [17, 0], sizes = [15, 128], strides = [1, 1]} : vector<32x128xf32> to vector<15x128xf32>
    %c16_51 = arith.constant 16 : index
    %c256_52 = arith.constant 256 : index
    %49 = vector.load %arg7[%c16_51, %c256_52] : memref<32x384xf32, #tpu.memory_space<vmem>>, vector<15x128xf32>
    tpu.vector_store %arg7[%c16_51, %c256_52], %48 {strides = array<i32>} : memref<32x384xf32, #tpu.memory_space<vmem>>, vector<15x128xf32>,
    %c0_53 = arith.constant 0 : index
    %c0_54 = arith.constant 0 : index
    %50 = vector.load %arg7[%c0_53, %c0_54] : memref<32x384xf32, #tpu.memory_space<vmem>>, vector<32x384xf32>
    %c0_55 = arith.constant 0 : index
    %c0_56 = arith.constant 0 : index
    %51 = vector.load %arg4[%c0_55, %c0_56] : memref<384x128xf32, #tpu.memory_space<vmem>>, vector<384x128xf32>
    %cst_57 = arith.constant dense<0.000000e+00> : vector<32x128xf32>
    %52 = tpu.matmul %50, %51, %cst_57 {dimension_numbers = #tpu.dot_dimension_numbers<[1], [0], [0], [1], [0, 0, 1, 1], [], []>} : vector<32x384xf32>, vector<384x128xf32>, vector<32x128xf32> -> vector<32x128xf32>
    %c0_58 = arith.constant 0 : index
    %c0_59 = arith.constant 0 : index
    %53 = vector.load %arg5[%c0_58, %c0_59] : memref<1x128xf32, #tpu.memory_space<vmem>>, vector<1x128xf32>
    %54 = vector.broadcast %53 : vector<1x128xf32> to vector<32x128xf32>
    %55 = arith.addf %52, %54 : vector<32x128xf32>
    %cst_60 = arith.constant 0.000000e+00 : f32
    %56 = vector.broadcast %cst_60 : f32 to vector<32x128xf32>
    %57 = arith.maximumf %55, %56 : vector<32x128xf32>
    %c0_61 = arith.constant 0 : index
    %c0_62 = arith.constant 0 : index
    %c0_63 = arith.constant 0 : index
    %58 = vector.load %arg1[%c0_61, %c0_62, %c0_63] : memref<2x16x128xf32, #tpu.memory_space<vmem>>, vector<1x16x128xf32>
    %59 = vector.shape_cast %58 : vector<1x16x128xf32> to vector<16x128xf32>
    %60 = vector.extract_strided_slice %57 {offsets = [0, 0], sizes = [16, 128], strides = [1, 1]} : vector<32x128xf32> to vector<16x128xf32>
    %61 = arith.addf %60, %59 : vector<16x128xf32>
    %cst_64 = arith.constant 0.000000e+00 : f32
    %62 = vector.broadcast %cst_64 : f32 to vector<16x128xf32>
    %63 = arith.maximumf %61, %62 : vector<16x128xf32>
    %c0_65 = arith.constant 0 : index
    %c0_66 = arith.constant 0 : index
    %c0_67 = arith.constant 0 : index
    %64 = vector.load %arg6[%c0_65, %c0_66, %c0_67] : memref<2x16x128xf32, #tpu.memory_space<vmem>>, vector<1x16x128xf32>
    %65 = vector.shape_cast %64 : vector<1x16x128xf32> to vector<16x128xf32>
    %66 = vector.shape_cast %63 : vector<16x128xf32> to vector<1x16x128xf32>
    tpu.vector_store %arg6[%c0_65, %c0_66, %c0_67], %66 {strides = array<i32>} : memref<2x16x128xf32, #tpu.memory_space<vmem>>, vector<1x16x128xf32>,
    %c1_68 = arith.constant 1 : index
    %c0_69 = arith.constant 0 : index
    %c0_70 = arith.constant 0 : index
    %67 = vector.load %arg1[%c1_68, %c0_69, %c0_70] : memref<2x16x128xf32, #tpu.memory_space<vmem>>, vector<1x16x128xf32>
    %68 = vector.shape_cast %67 : vector<1x16x128xf32> to vector<16x128xf32>
    %69 = vector.extract_strided_slice %57 {offsets = [16, 0], sizes = [16, 128], strides = [1, 1]} : vector<32x128xf32> to vector<16x128xf32>
    %70 = arith.addf %69, %68 : vector<16x128xf32>
    %cst_71 = arith.constant 0.000000e+00 : f32
    %71 = vector.broadcast %cst_71 : f32 to vector<16x128xf32>
    %72 = arith.maximumf %70, %71 : vector<16x128xf32>
    %c1_72 = arith.constant 1 : index
    %c0_73 = arith.constant 0 : index
    %c0_74 = arith.constant 0 : index
    %73 = vector.load %arg6[%c1_72, %c0_73, %c0_74] : memref<2x16x128xf32, #tpu.memory_space<vmem>>, vector<1x16x128xf32>
    %74 = vector.shape_cast %73 : vector<1x16x128xf32> to vector<16x128xf32>
    %75 = vector.shape_cast %72 : vector<16x128xf32> to vector<1x16x128xf32>
    tpu.vector_store %arg6[%c1_72, %c0_73, %c0_74], %75 {strides = array<i32>} : memref<2x16x128xf32, #tpu.memory_space<vmem>>, vector<1x16x128xf32>,
    return
  }
  func.func @transform_0(%arg0: i32) -> (i32, i32, i32) {
    %c0_i32 = arith.constant 0 : i32
    %c0_i32_0 = arith.constant 0 : i32
    %c0_i32_1 = arith.constant 0 : i32
    return %arg0, %c0_i32, %c0_i32_0 : i32, i32, i32
  }
  func.func @transform_1(%arg0: i32) -> (i32, i32) {
    %c0_i32 = arith.constant 0 : i32
    %c0_i32_0 = arith.constant 0 : i32
    %c0_i32_1 = arith.constant 0 : i32
    return %c0_i32, %c0_i32_0 : i32, i32
  }
  func.func @transform_2(%arg0: i32) -> (i32, i32) {
    %c0_i32 = arith.constant 0 : i32
    %c0_i32_0 = arith.constant 0 : i32
    %c0_i32_1 = arith.constant 0 : i32
    return %c0_i32, %c0_i32_0 : i32, i32
  }
  func.func @transform_3(%arg0: i32) -> (i32, i32) {
    %c0_i32 = arith.constant 0 : i32
    %c0_i32_0 = arith.constant 0 : i32
    %c0_i32_1 = arith.constant 0 : i32
    return %c0_i32, %c0_i32_0 : i32, i32
  }
  func.func @transform_4(%arg0: i32) -> (i32, i32) {
    %c0_i32 = arith.constant 0 : i32
    %c0_i32_0 = arith.constant 0 : i32
    %c0_i32_1 = arith.constant 0 : i32
    return %c0_i32, %c0_i32_0 : i32, i32
  }
  func.func @transform_5(%arg0: i32) -> (i32, i32, i32) {
    %c0_i32 = arith.constant 0 : i32
    %c0_i32_0 = arith.constant 0 : i32
    %c0_i32_1 = arith.constant 0 : i32
    return %arg0, %c0_i32, %c0_i32_0 : i32, i32, i32
  }
}

module attributes {stable_mosaic.version = 11 : i64} {
  func.func @basic_block_kernel(%arg0: i32, %arg1: memref<2x16x128xf32, #tpu.memory_space<vmem>>, %arg2: memref<384x128xf32, #tpu.memory_space<vmem>>, %arg3: memref<1x128xf32, #tpu.memory_space<vmem>>, %arg4: memref<384x128xf32, #tpu.memory_space<vmem>>, %arg5: memref<1x128xf32, #tpu.memory_space<vmem>>, %arg6: memref<2x16x128xf32, #tpu.memory_space<vmem>>, %arg7: memref<32x384xf32, #tpu.memory_space<vmem>>) attributes {dimension_semantics = [#tpu.dimension_semantics<parallel>], iteration_bounds = array<i64: 1>, scalar_prefetch = 0 : i64, scratch_operands = 1 : i64, tpu.core_type = #tpu.core_type<tc>, window_params = [{transform_indices = @transform_0, window_bounds = array<i64: 2, 16, 128>}, {pipeline_mode = #tpu.pipeline_mode<synchronous>, transform_indices = @transform_1, window_bounds = array<i64: 384, 128>}, {pipeline_mode = #tpu.pipeline_mode<synchronous>, transform_indices = @transform_2, window_bounds = array<i64: 1, 128>}, {pipeline_mode = #tpu.pipeline_mode<synchronous>, transform_indices = @transform_3, window_bounds = array<i64: 384, 128>}, {pipeline_mode = #tpu.pipeline_mode<synchronous>, transform_indices = @transform_4, window_bounds = array<i64: 1, 128>}, {transform_indices = @transform_5, window_bounds = array<i64: 2, 16, 128>}]} {
    %c0 = arith.constant 0 : index
    %c0_0 = arith.constant 0 : index
    %c0_1 = arith.constant 0 : index
    %0 = vector.load %arg1[%c0, %c0_0, %c0_1] : memref<2x16x128xf32, #tpu.memory_space<vmem>>, vector<1x16x128xf32>
    %1 = vector.shape_cast %0 : vector<1x16x128xf32> to vector<16x128xf32>
    %cst = arith.constant 0.000000e+00 : f32
    %2 = vector.broadcast %cst : f32 to vector<1x128xf32>
    %c0_2 = arith.constant 0 : index
    %c0_3 = arith.constant 0 : index
    %3 = vector.load %arg7[%c0_2, %c0_3] : memref<32x384xf32, #tpu.memory_space<vmem>>, vector<1x128xf32>
    tpu.vector_store %arg7[%c0_2, %c0_3], %2 {strides = array<i32>} : memref<32x384xf32, #tpu.memory_space<vmem>>, vector<1x128xf32>,
    %4 = vector.extract_strided_slice %1 {offsets = [0, 0], sizes = [15, 128], strides = [1, 1]} : vector<16x128xf32> to vector<15x128xf32>
    %c1 = arith.constant 1 : index
    %c0_4 = arith.constant 0 : index
    %5 = vector.load %arg7[%c1, %c0_4] : memref<32x384xf32, #tpu.memory_space<vmem>>, vector<15x128xf32>
    tpu.vector_store %arg7[%c1, %c0_4], %4 {strides = array<i32>} : memref<32x384xf32, #tpu.memory_space<vmem>>, vector<15x128xf32>,
    %c0_5 = arith.constant 0 : index
    %c128 = arith.constant 128 : index
    %6 = vector.load %arg7[%c0_5, %c128] : memref<32x384xf32, #tpu.memory_space<vmem>>, vector<16x128xf32>
    tpu.vector_store %arg7[%c0_5, %c128], %1 {strides = array<i32>} : memref<32x384xf32, #tpu.memory_space<vmem>>, vector<16x128xf32>,
    %cst_6 = arith.constant 0.000000e+00 : f32
    %7 = vector.broadcast %cst_6 : f32 to vector<1x128xf32>
    %c15 = arith.constant 15 : index
    %c256 = arith.constant 256 : index
    %8 = vector.load %arg7[%c15, %c256] : memref<32x384xf32, #tpu.memory_space<vmem>>, vector<1x128xf32>
    tpu.vector_store %arg7[%c15, %c256], %7 {strides = array<i32>} : memref<32x384xf32, #tpu.memory_space<vmem>>, vector<1x128xf32>,
    %9 = vector.extract_strided_slice %1 {offsets = [1, 0], sizes = [15, 128], strides = [1, 1]} : vector<16x128xf32> to vector<15x128xf32>
    %c0_7 = arith.constant 0 : index
    %c256_8 = arith.constant 256 : index
    %10 = vector.load %arg7[%c0_7, %c256_8] : memref<32x384xf32, #tpu.memory_space<vmem>>, vector<15x128xf32>
    tpu.vector_store %arg7[%c0_7, %c256_8], %9 {strides = array<i32>} : memref<32x384xf32, #tpu.memory_space<vmem>>, vector<15x128xf32>,
    %c1_9 = arith.constant 1 : index
    %c0_10 = arith.constant 0 : index
    %c0_11 = arith.constant 0 : index
    %11 = vector.load %arg1[%c1_9, %c0_10, %c0_11] : memref<2x16x128xf32, #tpu.memory_space<vmem>>, vector<1x16x128xf32>
    %12 = vector.shape_cast %11 : vector<1x16x128xf32> to vector<16x128xf32>
    %cst_12 = arith.constant 0.000000e+00 : f32
    %13 = vector.broadcast %cst_12 : f32 to vector<1x128xf32>
    %c16 = arith.constant 16 : index
    %c0_13 = arith.constant 0 : index
    %14 = vector.load %arg7[%c16, %c0_13] : memref<32x384xf32, #tpu.memory_space<vmem>>, vector<1x128xf32>
    tpu.vector_store %arg7[%c16, %c0_13], %13 {strides = array<i32>} : memref<32x384xf32, #tpu.memory_space<vmem>>, vector<1x128xf32>,
    %15 = vector.extract_strided_slice %12 {offsets = [0, 0], sizes = [15, 128], strides = [1, 1]} : vector<16x128xf32> to vector<15x128xf32>
    %c17 = arith.constant 17 : index
    %c0_14 = arith.constant 0 : index
    %16 = vector.load %arg7[%c17, %c0_14] : memref<32x384xf32, #tpu.memory_space<vmem>>, vector<15x128xf32>
    tpu.vector_store %arg7[%c17, %c0_14], %15 {strides = array<i32>} : memref<32x384xf32, #tpu.memory_space<vmem>>, vector<15x128xf32>,
    %c16_15 = arith.constant 16 : index
    %c128_16 = arith.constant 128 : index
    %17 = vector.load %arg7[%c16_15, %c128_16] : memref<32x384xf32, #tpu.memory_space<vmem>>, vector<16x128xf32>
    tpu.vector_store %arg7[%c16_15, %c128_16], %12 {strides = array<i32>} : memref<32x384xf32, #tpu.memory_space<vmem>>, vector<16x128xf32>,
    %cst_17 = arith.constant 0.000000e+00 : f32
    %18 = vector.broadcast %cst_17 : f32 to vector<1x128xf32>
    %c31 = arith.constant 31 : index
    %c256_18 = arith.constant 256 : index
    %19 = vector.load %arg7[%c31, %c256_18] : memref<32x384xf32, #tpu.memory_space<vmem>>, vector<1x128xf32>
    tpu.vector_store %arg7[%c31, %c256_18], %18 {strides = array<i32>} : memref<32x384xf32, #tpu.memory_space<vmem>>, vector<1x128xf32>,
    %20 = vector.extract_strided_slice %12 {offsets = [1, 0], sizes = [15, 128], strides = [1, 1]} : vector<16x128xf32> to vector<15x128xf32>
    %c16_19 = arith.constant 16 : index
    %c256_20 = arith.constant 256 : index
    %21 = vector.load %arg7[%c16_19, %c256_20] : memref<32x384xf32, #tpu.memory_space<vmem>>, vector<15x128xf32>
    tpu.vector_store %arg7[%c16_19, %c256_20], %20 {strides = array<i32>} : memref<32x384xf32, #tpu.memory_space<vmem>>, vector<15x128xf32>,
    %c0_21 = arith.constant 0 : index
    %c0_22 = arith.constant 0 : index
    %22 = vector.load %arg7[%c0_21, %c0_22] : memref<32x384xf32, #tpu.memory_space<vmem>>, vector<32x384xf32>
    %c0_23 = arith.constant 0 : index
    %c0_24 = arith.constant 0 : index
    %23 = vector.load %arg2[%c0_23, %c0_24] : memref<384x128xf32, #tpu.memory_space<vmem>>, vector<384x128xf32>
    %cst_25 = arith.constant dense<0.000000e+00> : vector<32x128xf32>
    %24 = tpu.matmul %22, %23, %cst_25 {dimension_numbers = #tpu.dot_dimension_numbers<[1], [0], [0], [1], [0, 0, 1, 1], [], []>} : vector<32x384xf32>, vector<384x128xf32>, vector<32x128xf32> -> vector<32x128xf32>
    %c0_26 = arith.constant 0 : index
    %c0_27 = arith.constant 0 : index
    %25 = vector.load %arg3[%c0_26, %c0_27] : memref<1x128xf32, #tpu.memory_space<vmem>>, vector<1x128xf32>
    %26 = vector.broadcast %25 : vector<1x128xf32> to vector<32x128xf32>
    %27 = arith.addf %24, %26 : vector<32x128xf32>
    %cst_28 = arith.constant 0.000000e+00 : f32
    %28 = vector.broadcast %cst_28 : f32 to vector<32x128xf32>
    %29 = arith.maximumf %27, %28 : vector<32x128xf32>
    %cst_29 = arith.constant 0.000000e+00 : f32
    %30 = vector.broadcast %cst_29 : f32 to vector<1x128xf32>
    %c0_30 = arith.constant 0 : index
    %c0_31 = arith.constant 0 : index
    %31 = vector.load %arg7[%c0_30, %c0_31] : memref<32x384xf32, #tpu.memory_space<vmem>>, vector<1x128xf32>
    tpu.vector_store %arg7[%c0_30, %c0_31], %30 {strides = array<i32>} : memref<32x384xf32, #tpu.memory_space<vmem>>, vector<1x128xf32>,
    %32 = vector.extract_strided_slice %29 {offsets = [0, 0], sizes = [15, 128], strides = [1, 1]} : vector<32x128xf32> to vector<15x128xf32>
    %c1_32 = arith.constant 1 : index
    %c0_33 = arith.constant 0 : index
    %33 = vector.load %arg7[%c1_32, %c0_33] : memref<32x384xf32, #tpu.memory_space<vmem>>, vector<15x128xf32>
    tpu.vector_store %arg7[%c1_32, %c0_33], %32 {strides = array<i32>} : memref<32x384xf32, #tpu.memory_space<vmem>>, vector<15x128xf32>,
    %34 = vector.extract_strided_slice %29 {offsets = [0, 0], sizes = [16, 128], strides = [1, 1]} : vector<32x128xf32> to vector<16x128xf32>
    %c0_34 = arith.constant 0 : index
    %c128_35 = arith.constant 128 : index
    %35 = vector.load %arg7[%c0_34, %c128_35] : memref<32x384xf32, #tpu.memory_space<vmem>>, vector<16x128xf32>
    tpu.vector_store %arg7[%c0_34, %c128_35], %34 {strides = array<i32>} : memref<32x384xf32, #tpu.memory_space<vmem>>, vector<16x128xf32>,
    %cst_36 = arith.constant 0.000000e+00 : f32
    %36 = vector.broadcast %cst_36 : f32 to vector<1x128xf32>
    %c15_37 = arith.constant 15 : index
    %c256_38 = arith.constant 256 : index
    %37 = vector.load %arg7[%c15_37, %c256_38] : memref<32x384xf32, #tpu.memory_space<vmem>>, vector<1x128xf32>
    tpu.vector_store %arg7[%c15_37, %c256_38], %36 {strides = array<i32>} : memref<32x384xf32, #tpu.memory_space<vmem>>, vector<1x128xf32>,
    %38 = vector.extract_strided_slice %29 {offsets = [1, 0], sizes = [15, 128], strides = [1, 1]} : vector<32x128xf32> to vector<15x128xf32>
    %c0_39 = arith.constant 0 : index
    %c256_40 = arith.constant 256 : index
    %39 = vector.load %arg7[%c0_39, %c256_40] : memref<32x384xf32, #tpu.memory_space<vmem>>, vector<15x128xf32>
    tpu.vector_store %arg7[%c0_39, %c256_40], %38 {strides = array<i32>} : memref<32x384xf32, #tpu.memory_space<vmem>>, vector<15x128xf32>,
    %cst_41 = arith.constant 0.000000e+00 : f32
    %40 = vector.broadcast %cst_41 : f32 to vector<1x128xf32>
    %c16_42 = arith.constant 16 : index
    %c0_43 = arith.constant 0 : index
    %41 = vector.load %arg7[%c16_42, %c0_43] : memref<32x384xf32, #tpu.memory_space<vmem>>, vector<1x128xf32>
    tpu.vector_store %arg7[%c16_42, %c0_43], %40 {strides = array<i32>} : memref<32x384xf32, #tpu.memory_space<vmem>>, vector<1x128xf32>,
    %42 = vector.extract_strided_slice %29 {offsets = [16, 0], sizes = [15, 128], strides = [1, 1]} : vector<32x128xf32> to vector<15x128xf32>
    %c17_44 = arith.constant 17 : index
    %c0_45 = arith.constant 0 : index
    %43 = vector.load %arg7[%c17_44, %c0_45] : memref<32x384xf32, #tpu.memory_space<vmem>>, vector<15x128xf32>
    tpu.vector_store %arg7[%c17_44, %c0_45], %42 {strides = array<i32>} : memref<32x384xf32, #tpu.memory_space<vmem>>, vector<15x128xf32>,
    %44 = vector.extract_strided_slice %29 {offsets = [16, 0], sizes = [16, 128], strides = [1, 1]} : vector<32x128xf32> to vector<16x128xf32>
    %c16_46 = arith.constant 16 : index
    %c128_47 = arith.constant 128 : index
    %45 = vector.load %arg7[%c16_46, %c128_47] : memref<32x384xf32, #tpu.memory_space<vmem>>, vector<16x128xf32>
    tpu.vector_store %arg7[%c16_46, %c128_47], %44 {strides = array<i32>} : memref<32x384xf32, #tpu.memory_space<vmem>>, vector<16x128xf32>,
    %cst_48 = arith.constant 0.000000e+00 : f32
    %46 = vector.broadcast %cst_48 : f32 to vector<1x128xf32>
    %c31_49 = arith.constant 31 : index
    %c256_50 = arith.constant 256 : index
    %47 = vector.load %arg7[%c31_49, %c256_50] : memref<32x384xf32, #tpu.memory_space<vmem>>, vector<1x128xf32>
    tpu.vector_store %arg7[%c31_49, %c256_50], %46 {strides = array<i32>} : memref<32x384xf32, #tpu.memory_space<vmem>>, vector<1x128xf32>,
    %48 = vector.extract_strided_slice %29 {offsets = [17, 0], sizes = [15, 128], strides = [1, 1]} : vector<32x128xf32> to vector<15x128xf32>
    %c16_51 = arith.constant 16 : index
    %c256_52 = arith.constant 256 : index
    %49 = vector.load %arg7[%c16_51, %c256_52] : memref<32x384xf32, #tpu.memory_space<vmem>>, vector<15x128xf32>
    tpu.vector_store %arg7[%c16_51, %c256_52], %48 {strides = array<i32>} : memref<32x384xf32, #tpu.memory_space<vmem>>, vector<15x128xf32>,
    %c0_53 = arith.constant 0 : index
    %c0_54 = arith.constant 0 : index
    %50 = vector.load %arg7[%c0_53, %c0_54] : memref<32x384xf32, #tpu.memory_space<vmem>>, vector<32x384xf32>
    %c0_55 = arith.constant 0 : index
    %c0_56 = arith.constant 0 : index
    %51 = vector.load %arg4[%c0_55, %c0_56] : memref<384x128xf32, #tpu.memory_space<vmem>>, vector<384x128xf32>
    %cst_57 = arith.constant dense<0.000000e+00> : vector<32x128xf32>
    %52 = tpu.matmul %50, %51, %cst_57 {dimension_numbers = #tpu.dot_dimension_numbers<[1], [0], [0], [1], [0, 0, 1, 1], [], []>} : vector<32x384xf32>, vector<384x128xf32>, vector<32x128xf32> -> vector<32x128xf32>
    %c0_58 = arith.constant 0 : index
    %c0_59 = arith.constant 0 : index
    %53 = vector.load %arg5[%c0_58, %c0_59] : memref<1x128xf32, #tpu.memory_space<vmem>>, vector<1x128xf32>
    %54 = vector.broadcast %53 : vector<1x128xf32> to vector<32x128xf32>
    %55 = arith.addf %52, %54 : vector<32x128xf32>
    %cst_60 = arith.constant 0.000000e+00 : f32
    %56 = vector.broadcast %cst_60 : f32 to vector<32x128xf32>
    %57 = arith.maximumf %55, %56 : vector<32x128xf32>
    %c0_61 = arith.constant 0 : index
    %c0_62 = arith.constant 0 : index
    %c0_63 = arith.constant 0 : index
    %58 = vector.load %arg1[%c0_61, %c0_62, %c0_63] : memref<2x16x128xf32, #tpu.memory_space<vmem>>, vector<1x16x128xf32>
    %59 = vector.shape_cast %58 : vector<1x16x128xf32> to vector<16x128xf32>
    %60 = vector.extract_strided_slice %57 {offsets = [0, 0], sizes = [16, 128], strides = [1, 1]} : vector<32x128xf32> to vector<16x128xf32>
    %61 = arith.addf %60, %59 : vector<16x128xf32>
    %cst_64 = arith.constant 0.000000e+00 : f32
    %62 = vector.broadcast %cst_64 : f32 to vector<16x128xf32>
    %63 = arith.maximumf %61, %62 : vector<16x128xf32>
    %c0_65 = arith.constant 0 : index
    %c0_66 = arith.constant 0 : index
    %c0_67 = arith.constant 0 : index
    %64 = vector.load %arg6[%c0_65, %c0_66, %c0_67] : memref<2x16x128xf32, #tpu.memory_space<vmem>>, vector<1x16x128xf32>
    %65 = vector.shape_cast %64 : vector<1x16x128xf32> to vector<16x128xf32>
    %66 = vector.shape_cast %63 : vector<16x128xf32> to vector<1x16x128xf32>
    tpu.vector_store %arg6[%c0_65, %c0_66, %c0_67], %66 {strides = array<i32>} : memref<2x16x128xf32, #tpu.memory_space<vmem>>, vector<1x16x128xf32>,
    %c1_68 = arith.constant 1 : index
    %c0_69 = arith.constant 0 : index
    %c0_70 = arith.constant 0 : index
    %67 = vector.load %arg1[%c1_68, %c0_69, %c0_70] : memref<2x16x128xf32, #tpu.memory_space<vmem>>, vector<1x16x128xf32>
    %68 = vector.shape_cast %67 : vector<1x16x128xf32> to vector<16x128xf32>
    %69 = vector.extract_strided_slice %57 {offsets = [16, 0], sizes = [16, 128], strides = [1, 1]} : vector<32x128xf32> to vector<16x128xf32>
    %70 = arith.addf %69, %68 : vector<16x128xf32>
    %cst_71 = arith.constant 0.000000e+00 : f32
    %71 = vector.broadcast %cst_71 : f32 to vector<16x128xf32>
    %72 = arith.maximumf %70, %71 : vector<16x128xf32>
    %c1_72 = arith.constant 1 : index
    %c0_73 = arith.constant 0 : index
    %c0_74 = arith.constant 0 : index
    %73 = vector.load %arg6[%c1_72, %c0_73, %c0_74] : memref<2x16x128xf32, #tpu.memory_space<vmem>>, vector<1x16x128xf32>
    %74 = vector.shape_cast %73 : vector<1x16x128xf32> to vector<16x128xf32>
    %75 = vector.shape_cast %72 : vector<16x128xf32> to vector<1x16x128xf32>
    tpu.vector_store %arg6[%c1_72, %c0_73, %c0_74], %75 {strides = array<i32>} : memref<2x16x128xf32, #tpu.memory_space<vmem>>, vector<1x16x128xf32>,
    return
  }
  func.func @transform_0(%arg0: i32) -> (i32, i32, i32) {
    %c0_i32 = arith.constant 0 : i32
    %c0_i32_0 = arith.constant 0 : i32
    %c0_i32_1 = arith.constant 0 : i32
    return %arg0, %c0_i32, %c0_i32_0 : i32, i32, i32
  }
  func.func @transform_1(%arg0: i32) -> (i32, i32) {
    %c0_i32 = arith.constant 0 : i32
    %c0_i32_0 = arith.constant 0 : i32
    %c0_i32_1 = arith.constant 0 : i32
    return %c0_i32, %c0_i32_0 : i32, i32
  }
  func.func @transform_2(%arg0: i32) -> (i32, i32) {
    %c0_i32 = arith.constant 0 : i32
    %c0_i32_0 = arith.constant 0 : i32
    %c0_i32_1 = arith.constant 0 : i32
    return %c0_i32, %c0_i32_0 : i32, i32
  }
  func.func @transform_3(%arg0: i32) -> (i32, i32) {
    %c0_i32 = arith.constant 0 : i32
    %c0_i32_0 = arith.constant 0 : i32
    %c0_i32_1 = arith.constant 0 : i32
    return %c0_i32, %c0_i32_0 : i32, i32
  }
  func.func @transform_4(%arg0: i32) -> (i32, i32) {
    %c0_i32 = arith.constant 0 : i32
    %c0_i32_0 = arith.constant 0 : i32
    %c0_i32_1 = arith.constant 0 : i32
    return %c0_i32, %c0_i32_0 : i32, i32
  }
  func.func @transform_5(%arg0: i32) -> (i32, i32, i32) {
    %c0_i32 = arith.constant 0 : i32
    %c0_i32_0 = arith.constant 0 : i32
    %c0_i32_1 = arith.constant 0 : i32
    return %arg0, %c0_i32, %c0_i32_0 : i32, i32, i32
  }
}

</mosaic_0001>

<bundles_post_ra>
// kernel: tpu_custom_call.1
= control target key start
LH: loop header
LB: loop body
LE: loop exit
PB: predicated region body
PF: predicated region fallthrough
CT: control target
= control target key end

     0   :  { %10 = vsyncpa [#allocation4], 0  ;;  %s791_s0 = inlined_call_operand.hbm [shape: f32[2,16,128], index: 0, kind: input, shape index: {}]   ;;  %s792_s1 = inlined_call_operand.hbm [shape: f32[384,128], index: 1, kind: input, shape index: {}]   ;;  %s793_s2 = inlined_call_operand.vmem [shape: f32[1,128], index: 2, kind: input, shape index: {}]   ;;  %s794_s3 = inlined_call_operand.hbm [shape: f32[384,128], index: 3, kind: input, shape index: {}]   ;;  %s795_s4 = inlined_call_operand.vmem [shape: f32[1,128], index: 4, kind: input, shape index: {}]   ;;  %s796_s5 = inlined_call_operand.hbm [shape: f32[2,16,128], index: 5, kind: output, shape index: {}]  }
   0x1   :  { %11 = vsyncpa [#allocation7], 0 }
   0x2   :  { %12 = vsyncpa [#allocation5], 0  ;;  %s30_s20 = sshll.u32 %s792_s1, 4  ;;  %s645_s21 = smov [#allocation6]   ;;  %s31_s20 = int_to_ptr.hbm [resolvable:$true] %s30_s20 }
   0x3   :  { %s32_s22 = sshll.u32 %s645_s21, 4  ;;  %s17_s25 = sshll.u32 %s791_s0, 4  ;;  %s33_s22 = int_to_ptr.vmem [resolvable:$true] %s32_s22  ;;  %s18_s25 = int_to_ptr.hbm [resolvable:$true] %s17_s25 }
   0x4   :  { %s646_s26 = smov 128   ;;  %s647_s27 = smov 8  }
   0x5   :  { %38 = dma.hbm_to_vmem [thread:$0]  %s31_s20, 6144, %s33_s22, [#allocation7], %s646_s26, %s646_s26, %s647_s27  }
   0x6   :  { %s648_s28 = smov [#allocation3]   ;;  %s45_s1 = sshll.u32 %s794_s3, 4  ;;  %s46_s1 = int_to_ptr.hbm [resolvable:$true] %s45_s1 }
   0x7   :  { %s19_s29 = sshll.u32 %s648_s28, 4  ;;  %s649_s0 = smov [#allocation8]   ;;  %s20_s29 = int_to_ptr.vmem [resolvable:$true] %s19_s29 }
   0x8   :  { %25 = dma.hbm_to_vmem [thread:$0]  %s18_s25, 512, %s20_s29, [#allocation4], %s646_s26, %s646_s26, %s647_s27  }
   0x9   :  { %s47_s7 = sshll.u32 %s649_s0, 4  ;;  %s48_s7 = int_to_ptr.vmem [resolvable:$true] %s47_s7 }
   0xa   :  { %53 = dma.hbm_to_vmem [thread:$0]  %s46_s1, 6144, %s48_s7, [#allocation7], %s646_s26, %s646_s26, %s647_s27  }
   0xb   :  { %639 = dma.done.wait [#allocation4], 512  }
   0xc   :  { %640 = vsyncadd [#allocation4], 4294966784 }
   0xd   :  { %641 = dma.done.wait [#allocation7], 12288  }
   0xe   :  { %642 = vsyncadd [#allocation7], 4294955008  ;;  %v650_v0 = vmov 0.0   ;;  %v174_v1 = vld [vmem:[#allocation6 + $0x178] sm:$0xff]  ;;  %v173_v3 = vld [vmem:[#allocation6 + $0x170] sm:$0xff]  ;;  %vm84_vm0 = vcmask 1046528  }
   0xf   :  { %70 = vst [vmem:[#allocation2] sm:$0x1] %v650_v0  ;;  %v142_v2 = vld [vmem:[#allocation6 + $0x78] sm:$0xff]  ;;  %237 = vmatpush.msra.mxu2 %v174_v1  ;;  %v141_v4 = vld [vmem:[#allocation6 + $0x70] sm:$0xff]  ;;  %v172_v6 = vld [vmem:[#allocation6 + $0x168] sm:$0xff]  ;;  %vm73_vm1 = vcmask 1040384  }
  0x10   :  { %83 = vst [vmem:[#allocation2 + $0x2f] sm:$0x1] %v650_v0  ;;  %179 = vmatpush.msra.mxu0 %v142_v2  ;;  %v158_v5 = vld [vmem:[#allocation6 + $0xf8] sm:$0xff]  ;;  %v140_v7 = vld [vmem:[#allocation6 + $0x68] sm:$0xff]  ;;  %v157_v8 = vld [vmem:[#allocation6 + $0xf0] sm:$0xff]  ;;  %s488_s13 = sshll.u32 %s796_s5, 4  ;;  %s489_s13 = int_to_ptr.hbm [resolvable:$true] %s488_s13 }
  0x11   :  { %95 = vst [vmem:[#allocation2 + $0x30] sm:$0x1] %v650_v0  ;;  %208 = vmatpush.msra.mxu1 %v158_v5  ;;  %238 = vmatpush.msra.mxu2 %v173_v3  ;;  %v156_v9 = vld [vmem:[#allocation6 + $0xe8] sm:$0xff]  ;;  %v171_v10 = vld [vmem:[#allocation6 + $0x160] sm:$0xff]  ;;  %v170_v13 = vld [vmem:[#allocation6 + $0x158] sm:$0xff] }
  0x12   :  { %107 = vst [vmem:[#allocation2 + $0x5f] sm:$0x1] %v650_v0  ;;  %180 = vmatpush.msra.mxu0 %v141_v4  ;;  %v139_v11 = vld [vmem:[#allocation6 + $0x60] sm:$0xff]  ;;  %v138_v14 = vld [vmem:[#allocation6 + $0x58] sm:$0xff]  ;;  %v169_v16 = vld [vmem:[#allocation6 + $0x150] sm:$0xff] }
  0x13   :  { %209 = vmatpush.msra.mxu1 %v157_v8  ;;  %239 = vmatpush.msra.mxu2 %v172_v6  ;;  %v155_v12 = vld [vmem:[#allocation6 + $0xe0] sm:$0xff]  ;;  %v154_v15 = vld [vmem:[#allocation6 + $0xd8] sm:$0xff]  ;;  %v137_v17 = vld [vmem:[#allocation6 + $0x50] sm:$0xff] }
  0x14   :  { %181 = vmatpush.msra.mxu0 %v140_v7  ;;  %v153_v18 = vld [vmem:[#allocation6 + $0xd0] sm:$0xff]  ;;  %v168_v19 = vld [vmem:[#allocation6 + $0x148] sm:$0xff]  ;;  %v167_v22 = vld [vmem:[#allocation6 + $0x140] sm:$0xff] }
  0x15   :  { %210 = vmatpush.msra.mxu1 %v156_v9  ;;  %240 = vmatpush.msra.mxu2 %v171_v10  ;;  %v136_v20 = vld [vmem:[#allocation6 + $0x48] sm:$0xff]  ;;  %v135_v23 = vld [vmem:[#allocation6 + $0x40] sm:$0xff]  ;;  %v166_v25 = vld [vmem:[#allocation6 + $0x138] sm:$0xff] }
  0x16   :  { %182 = vmatpush.msra.mxu0 %v139_v11  ;;  %v152_v21 = vld [vmem:[#allocation6 + $0xc8] sm:$0xff]  ;;  %v151_v24 = vld [vmem:[#allocation6 + $0xc0] sm:$0xff]  ;;  %v134_v26 = vld [vmem:[#allocation6 + $0x38] sm:$0xff] }
  0x17   :  { %211 = vmatpush.msra.mxu1 %v155_v12  ;;  %241 = vmatpush.msra.mxu2 %v170_v13  ;;  %v165_v27 = vld [vmem:[#allocation6 + $0x130] sm:$0xff]  ;;  %v150_v28 = vld [vmem:[#allocation6 + $0xb8] sm:$0xff]  ;;  %v704_v29 = vld [vmem:[#allocation3] sm:$0xff] }
  0x18   :  { %183 = vmatpush.msra.mxu0 %v138_v14  ;;  %v706_v30 = vld [vmem:[#allocation3 + $0x8] sm:$0xff]  ;;  %v133_v31 = vld [vmem:[#allocation6 + $0x30] sm:$0xff]  ;;  %v74_v35 = vrot.slane %v704_v29, 7  ;;  %v712_v37 = vld [vmem:[#allocation3 + $0x18] sm:$0xff]  ;;  %v85_v52 = vrot.slane %v704_v29, 1 }
  0x19   :  { %212 = vmatpush.msra.mxu1 %v154_v15  ;;  %242 = vmatpush.msra.mxu2 %v169_v16  ;;  %v164_v32 = vld [vmem:[#allocation6 + $0x128] sm:$0xff]  ;;  %v149_v33 = vld [vmem:[#allocation6 + $0xb0] sm:$0xff]  ;;  %v86_v34 = vrot.slane %v706_v30, 1  ;;  %v109_v39 = vrot.slane %v712_v37, 1  ;;  %v163_v42 = vld [vmem:[#allocation6 + $0x120] sm:$0xff]  ;;  %v75_v6 = vrot.slane %v706_v30, 7 }
  0x1a   :  { %184 = vmatpush.msra.mxu0 %v137_v17  ;;  %v710_v36 = vld [vmem:[#allocation3 + $0x10] sm:$0xff]  ;;  %v132_v38 = vld [vmem:[#allocation6 + $0x28] sm:$0xff]  ;;  %79 = vst [vmem:[#allocation2] sm:$0xfe] %v74_v35  ;;  %v131_v43 = vld [vmem:[#allocation6 + $0x20] sm:$0xff] }
  0x1b   :  { %213 = vmatpush.msra.mxu1 %v153_v18  ;;  %243 = vmatpush.msra.mxu2 %v168_v19  ;;  %91 = vst [vmem:[#allocation2 + $0x28] sm:$0x7f] %v86_v34  ;;  %v148_v40 = vld [vmem:[#allocation6 + $0xa8] sm:$0xff]  ;;  %v98_v41 = vrot.slane %v710_v36, 7  ;;  %v147_v44 = vld [vmem:[#allocation6 + $0xa0] sm:$0xff]  ;;  %v162_v45 = vld [vmem:[#allocation6 + $0x118] sm:$0xff]  ;;  %v87_v63 = vsel %vm84_vm0, %v85_v52, %v86_v34  ;;  %v76_v11 = vsel %vm73_vm1, %v74_v35, %v75_v6 }
  0x1c   :  { %185 = vmatpush.msra.mxu0 %v136_v20  ;;  %114 = vst [vmem:[#allocation2 + $0x58] sm:$0x7f] %v109_v39  ;;  %v130_v46 = vld [vmem:[#allocation6 + $0x18] sm:$0xff]  ;;  %v161_v48 = vld [vmem:[#allocation6 + $0x110] sm:$0xff]  ;;  %v160_v50 = vld [vmem:[#allocation6 + $0x108] sm:$0xff]  ;;  %v108_v15 = vrot.slane %v710_v36, 1 }
  0x1d   :  { %214 = vmatpush.msra.mxu1 %v152_v21  ;;  %244 = vmatpush.msra.mxu2 %v167_v22  ;;  %103 = vst [vmem:[#allocation2 + $0x30] sm:$0xfe] %v98_v41  ;;  %v146_v47 = vld [vmem:[#allocation6 + $0x98] sm:$0xff]  ;;  %v129_v49 = vld [vmem:[#allocation6 + $0x10] sm:$0xff]  ;;  %v128_v54 = vld [vmem:[#allocation6 + $0x8] sm:$0xff]  ;;  %v99_v18 = vrot.slane %v712_v37, 7 }
  0x1e   :  { %186 = vmatpush.msra.mxu0 %v135_v23  ;;  %v145_v51 = vld [vmem:[#allocation6 + $0x90] sm:$0xff]  ;;  %v337_v56 = vld [vmem:[#allocation8 + $0x78] sm:$0xff]  ;;  %v144_v57 = vld [vmem:[#allocation6 + $0x88] sm:$0xff]  ;;  %v110_v17 = vsel %vm84_vm0, %v108_v15, %v109_v39 }
  0x1f   :  { %215 = vmatpush.msra.mxu1 %v151_v24  ;;  %245 = vmatpush.msra.mxu2 %v166_v25  ;;  %v336_v59 = vld [vmem:[#allocation8 + $0x70] sm:$0xff]  ;;  %v159_v60 = vld [vmem:[#allocation6 + $0x100] sm:$0xff]  ;;  %v353_v2 = vld [vmem:[#allocation8 + $0xf8] sm:$0xff]  ;;  %v100_v19 = vsel %vm73_vm1, %v98_v41, %v99_v18 }
  0x20   :  { %187 = vmatpush.msra.mxu0 %v134_v26  ;;  %v127_v61 = vld [vmem:[#allocation6] sm:$0xff]  ;;  %374 = vmatpush.msra.mxu3 %v337_v56  ;;  %v335_v3 = vld [vmem:[#allocation8 + $0x68] sm:$0xff]  ;;  %v352_v4 = vld [vmem:[#allocation8 + $0xf0] sm:$0xff] }
  0x21   :  { %216 = vmatpush.msra.mxu1 %v150_v28  ;;  %246 = vmatpush.msra.mxu2 %v165_v27  ;;  %v115_v55 = vld [vmem:[#allocation2] sm:$0xff]  ;;  %v730_v5 = vld [vmem:[#allocation8 + $0x178] sm:$0xff]  ;;  %v734_v8 = vld [vmem:[#allocation8 + $0x170] sm:$0xff] }
  0x22   :  { %188 = vmatpush.msra.mxu0 %v133_v31  ;;  %v120_v53 = vld [vmem:[#allocation2 + $0x28] sm:$0xff]  ;;  %270 = vst [vmem:[#allocation2] sm:$0x1] %v650_v0  ;;  %v143_v1 = vld [vmem:[#allocation6 + $0x80] sm:$0xff]  ;;  %375 = vmatpush.msra.mxu3 %v336_v59  ;;  %v333_v9 = vld [vmem:[#allocation8 + $0x58] sm:$0xff] }
  0x23   :  { %217 = vmatpush.msra.mxu1 %v149_v33  ;;  %247 = vmatpush.msra.mxu2 %v164_v32  ;;  %282 = vst [vmem:[#allocation2 + $0x2f] sm:$0x1] %v650_v0  ;;  %v725_v58 = vld [vmem:[#allocation2 + $0x58] sm:$0xff]  ;;  %v334_v7 = vld [vmem:[#allocation8 + $0x60] sm:$0xff]  ;;  %v332_v13 = vld [vmem:[#allocation8 + $0x50] sm:$0xff] }
  0x24   :  { %189 = vmatpush.msra.mxu0 %v132_v38  ;;  %v121_v62 = vld [vmem:[#allocation2 + $0x30] sm:$0xff]  ;;  %302 = vst [vmem:[#allocation2 + $0x5f] sm:$0x1] %v650_v0  ;;  %376 = vmatpush.msra.mxu3 %v335_v3  ;;  %v350_v10 = vld [vmem:[#allocation8 + $0xe0] sm:$0xff]  ;;  %v349_v12 = vld [vmem:[#allocation8 + $0xd8] sm:$0xff] }
  0x25   :  { %218 = vmatpush.msra.mxu1 %v148_v40  ;;  %248 = vmatpush.msra.mxu2 %v163_v42  ;;  %290 = vst [vmem:[#allocation2 + $0x30] sm:$0x1] %v650_v0  ;;  %v351_v0 = vld [vmem:[#allocation8 + $0xe8] sm:$0xff]  ;;  %v348_v14 = vld [vmem:[#allocation8 + $0xd0] sm:$0xff]  ;;  %v346_v20 = vld [vmem:[#allocation8 + $0xc0] sm:$0xff] }
  0x26   :  { %190 = vmatpush.msra.mxu0 %v131_v43  ;;  %377 = vmatpush.msra.mxu3 %v334_v7  ;;  %v347_v16 = vld [vmem:[#allocation8 + $0xc8] sm:$0xff]  ;;  %v345_v22 = vld [vmem:[#allocation8 + $0xb8] sm:$0xff]  ;;  %v756_v23 = vld [vmem:[#allocation8 + $0x160] sm:$0xff] }
  0x27   :  { %219 = vmatpush.msra.mxu1 %v147_v44  ;;  %249 = vmatpush.msra.mxu2 %v162_v45  ;;  %v753_v21 = vld [vmem:[#allocation8 + $0x168] sm:$0xff]  ;;  %v344_v24 = vld [vmem:[#allocation8 + $0xb0] sm:$0xff]  ;;  %v759_v25 = vld [vmem:[#allocation8 + $0x158] sm:$0xff] }
  0x28   :  { %191 = vmatpush.msra.mxu0 %v130_v46  ;;  %378 = vmatpush.msra.mxu3 %v333_v9  ;;  %v343_v26 = vld [vmem:[#allocation8 + $0xa8] sm:$0xff]  ;;  %v762_v27 = vld [vmem:[#allocation8 + $0x150] sm:$0xff]  ;;  %v342_v31 = vld [vmem:[#allocation8 + $0xa0] sm:$0xff] }
  0x29   :  { %220 = vmatpush.msra.mxu1 %v146_v47  ;;  %250 = vmatpush.msra.mxu2 %v161_v48  ;;  %v331_v28 = vld [vmem:[#allocation8 + $0x48] sm:$0xff]  ;;  %v330_v33 = vld [vmem:[#allocation8 + $0x40] sm:$0xff]  ;;  %v341_v34 = vld [vmem:[#allocation8 + $0x98] sm:$0xff] }
  0x2a   :  { %192 = vmatpush.msra.mxu0 %v129_v49  ;;  %379 = vmatpush.msra.mxu3 %v332_v13  ;;  %v363_v32 = vld [vmem:[#allocation8 + $0x148] sm:$0xff]  ;;  %v362_v35 = vld [vmem:[#allocation8 + $0x140] sm:$0xff]  ;;  %v329_v38 = vld [vmem:[#allocation8 + $0x38] sm:$0xff] }
  0x2b   :  { %221 = vmatpush.msra.mxu1 %v145_v51  ;;  %251 = vmatpush.msra.mxu2 %v160_v50  ;;  %v340_v39 = vld [vmem:[#allocation8 + $0x90] sm:$0xff]  ;;  %v361_v41 = vld [vmem:[#allocation8 + $0x138] sm:$0xff]  ;;  %v339_v42 = vld [vmem:[#allocation8 + $0x88] sm:$0xff] }
  0x2c   :  { %193 = vmatpush.msra.mxu0 %v128_v54  ;;  %380 = vmatpush.msra.mxu3 %v331_v28  ;;  %v328_v40 = vld [vmem:[#allocation8 + $0x30] sm:$0xff]  ;;  %v327_v43 = vld [vmem:[#allocation8 + $0x28] sm:$0xff]  ;;  %v338_v45 = vld [vmem:[#allocation8 + $0x80] sm:$0xff] }
  0x2d   :  { %222 = vmatpush.msra.mxu1 %v144_v57  ;;  %252 = vmatpush.msra.mxu2 %v159_v60  ;;  %v360_v44 = vld [vmem:[#allocation8 + $0x130] sm:$0xff]  ;;  %v326_v46 = vld [vmem:[#allocation8 + $0x20] sm:$0xff]  ;;  %v359_v47 = vld [vmem:[#allocation8 + $0x128] sm:$0xff] }
  0x2e   :  { %194 = vmatpush.msra.mxu0 %v127_v61  ;;  %253 = vmatmul.f32.vlgmr.msra.gmra.mxu2 %v87_v63  ;;  %v358_v48 = vld [vmem:[#allocation8 + $0x120] sm:$0xff]  ;;  %v325_v49 = vld [vmem:[#allocation8 + $0x18] sm:$0xff]  ;;  %v324_v51 = vld [vmem:[#allocation8 + $0x10] sm:$0xff] }
  0x2f   :  { %195 = vmatmul.f32.vlgmr.msra.gmra.mxu0 %v115_v55  ;;  %223 = vmatpush.msra.mxu1 %v143_v1  ;;  %v357_v50 = vld [vmem:[#allocation8 + $0x118] sm:$0xff]  ;;  %v356_v52 = vld [vmem:[#allocation8 + $0x110] sm:$0xff]  ;;  %v355_v54 = vld [vmem:[#allocation8 + $0x108] sm:$0xff] }
  0x30   :  { %403 = vmatpush.msrb.mxu0 %v353_v2  ;;  %224 = vmatmul.f32.vlgmr.msra.gmra.mxu1 %v704_v29  ;;  %v322_v55 = vld [vmem:[#allocation8] sm:$0xff] }
  0x31   :  { %432 = vmatpush.msrb.mxu1 %v730_v5  ;;  %502 = vmatpush.msrb.mxu2 %v353_v2  ;;  %v354_v56 = vld [vmem:[#allocation8 + $0x100] sm:$0xff] }
  0x32   :  { %404 = vmatpush.msrb.mxu0 %v352_v4  ;;  %381 = vmatpush.msra.mxu3 %v330_v33  ;;  %v541_v57 = vld [vmem:[%s793_s2] ss:$0 sm:$0xff] }
  0x33   :  { %433 = vmatpush.msrb.mxu1 %v734_v8  ;;  %503 = vmatpush.msrb.mxu2 %v352_v4 }
  0x34   :  { %405 = vmatpush.msrb.mxu0 %v351_v0  ;;  %382 = vmatpush.msra.mxu3 %v329_v38 }
  0x35   :  { %504 = vmatpush.msrb.mxu2 %v351_v0  ;;  %434 = vmatpush.msrb.mxu1 %v753_v21 }
  0x36   :  { %406 = vmatpush.msrb.mxu0 %v350_v10  ;;  %256 = vmatmul.f32.gmra.mxu2 %v120_v53  ;;  %v323_v53 = vld [vmem:[#allocation8 + $0x8] sm:$0xff] }
  0x37   :  { %198 = vmatmul.f32.gmra.mxu0 %v76_v11  ;;  %505 = vmatpush.msrb.mxu2 %v350_v10 }
  0x38   :  { %407 = vmatpush.msrb.mxu0 %v349_v12  ;;  %227 = vmatmul.f32.gmra.mxu1 %v706_v30 }
  0x39   :  { %506 = vmatpush.msrb.mxu2 %v349_v12  ;;  %435 = vmatpush.msrb.mxu1 %v756_v23 }
  0x3a   :  { %408 = vmatpush.msrb.mxu0 %v348_v14  ;;  %383 = vmatpush.msra.mxu3 %v328_v40 }
  0x3b   :  { %507 = vmatpush.msrb.mxu2 %v348_v14  ;;  %436 = vmatpush.msrb.mxu1 %v759_v25 }
  0x3c   :  { %409 = vmatpush.msrb.mxu0 %v347_v16  ;;  %384 = vmatpush.msra.mxu3 %v327_v43 }
  0x3d   :  { %508 = vmatpush.msrb.mxu2 %v347_v16  ;;  %437 = vmatpush.msrb.mxu1 %v762_v27 }
  0x3e   :  { %259 = vmatmul.f32.gmra.mxu2 %v110_v17  ;;  %410 = vmatpush.msrb.mxu0 %v346_v20 }
  0x3f   :  { %201 = vmatmul.f32.gmra.mxu0 %v121_v62  ;;  %509 = vmatpush.msrb.mxu2 %v346_v20 }
  0x40   :  { %230 = vmatmul.f32.gmra.mxu1 %v710_v36  ;;  %411 = vmatpush.msrb.mxu0 %v345_v22 }
  0x41   :  { %510 = vmatpush.msrb.mxu2 %v345_v22  ;;  %438 = vmatpush.msrb.mxu1 %v363_v32 }
  0x42   :  { %412 = vmatpush.msrb.mxu0 %v344_v24  ;;  %385 = vmatpush.msra.mxu3 %v326_v46 }
  0x43   :  { %511 = vmatpush.msrb.mxu2 %v344_v24  ;;  %439 = vmatpush.msrb.mxu1 %v362_v35 }
  0x44   :  { %413 = vmatpush.msrb.mxu0 %v343_v26  ;;  %386 = vmatpush.msra.mxu3 %v325_v49 }
  0x45   :  { %512 = vmatpush.msrb.mxu2 %v343_v26  ;;  %440 = vmatpush.msrb.mxu1 %v361_v41 }
  0x46   :  { %262 = vmatmul.f32.gmra.mxu2 %v725_v58  ;;  %414 = vmatpush.msrb.mxu0 %v342_v31 }
  0x47   :  { %204 = vmatmul.f32.gmra.mxu0 %v100_v19  ;;  %513 = vmatpush.msrb.mxu2 %v342_v31 }
  0x48   :  { %233 = vmatmul.f32.gmra.mxu1 %v712_v37  ;;  %415 = vmatpush.msrb.mxu0 %v341_v34 }
  0x49   :  { %514 = vmatpush.msrb.mxu2 %v341_v34  ;;  %441 = vmatpush.msrb.mxu1 %v360_v44 }
  0x4a   :  { %416 = vmatpush.msrb.mxu0 %v340_v39  ;;  %387 = vmatpush.msra.mxu3 %v324_v51 }
  0x4b   :  { %515 = vmatpush.msrb.mxu2 %v340_v39  ;;  %442 = vmatpush.msrb.mxu1 %v359_v47 }
  0x4c   :  { %417 = vmatpush.msrb.mxu0 %v339_v42  ;;  %388 = vmatpush.msra.mxu3 %v323_v53 }
  0x4d   :  { %516 = vmatpush.msrb.mxu2 %v339_v42  ;;  %443 = vmatpush.msrb.mxu1 %v358_v48  ;;  %v542_v42 = vld [vmem:[%s795_s4] ss:$0 sm:$0xff]  ;;  %s651_s4 = smov [#allocation9]  }
  0x4e   :  { %418 = vmatpush.msrb.mxu0 %v338_v45  ;;  %389 = vmatpush.msra.mxu3 %v322_v55  ;;  %s486_s10 = sshll.u32 %s651_s4, 4  ;;  %s487_s10 = int_to_ptr.vmem [resolvable:$true] %s486_s10 }
  0x4f   :  { %517 = vmatpush.msrb.mxu2 %v338_v45  ;;  %444 = vmatpush.msrb.mxu1 %v357_v50 }
  0x50   :  { %518 = vmatpush.msrb.mxu3 %v730_v5 }
  0x51   :  { %445 = vmatpush.msrb.mxu1 %v356_v52 }
  0x52   :  { %519 = vmatpush.msrb.mxu3 %v734_v8 }
  0x53   :  { %446 = vmatpush.msrb.mxu1 %v355_v54 }
  0x54   :  { %520 = vmatpush.msrb.mxu3 %v753_v21 }
  0x55   :  { %447 = vmatpush.msrb.mxu1 %v354_v56 }
  0x56   :  { %521 = vmatpush.msrb.mxu3 %v756_v23 }
  0x58   :  { %522 = vmatpush.msrb.mxu3 %v759_v25 }
  0x5a   :  { %523 = vmatpush.msrb.mxu3 %v762_v27 }
  0x5c   :  { %524 = vmatpush.msrb.mxu3 %v363_v32 }
  0x5e   :  { %525 = vmatpush.msrb.mxu3 %v362_v35 }
  0x60   :  { %526 = vmatpush.msrb.mxu3 %v361_v41 }
  0x62   :  { %527 = vmatpush.msrb.mxu3 %v360_v44 }
  0x64   :  { %528 = vmatpush.msrb.mxu3 %v359_v47 }
  0x66   :  { %529 = vmatpush.msrb.mxu3 %v358_v48 }
  0x68   :  { %530 = vmatpush.msrb.mxu3 %v357_v50 }
  0x6a   :  { %531 = vmatpush.msrb.mxu3 %v356_v52 }
  0x6c   :  { %532 = vmatpush.msrb.mxu3 %v355_v54 }
  0x6e   :  { %533 = vmatpush.msrb.mxu3 %v354_v56 }
  0xac   :  { %v196_v58 = vpop.f32.mrf.mxu0 }
  0xad   :  { %v197_v59 = vadd.f32 %v541_v57, %v196_v58  ;;  %v225_v60 = vpop.f32.mrf.mxu1 }
  0xaf   :  { %v226_v61 = vadd.f32 %v225_v60, %v197_v59 }
  0xb1   :  { %v254_v62 = vpop.f32.mrf.mxu2 }
  0xb2   :  { %v255_v63 = vadd.f32 %v254_v62, %v226_v61 }
  0xb4   :  { %v199_v1 = vpop.f32.mrf.mxu0  ;;  %v266_v2 = vmax.f32 %v255_v63, 0.0 }
  0xb5   :  { %v200_v3 = vadd.f32 %v541_v57, %v199_v1  ;;  %v228_v4 = vpop.f32.mrf.mxu1 }
  0xb6   :  { %v273_v5 = vrot.slane %v266_v2, 7  ;;  %419 = vmatmul.f32.vlgmr.msrb.gmra.mxu0 %v266_v2  ;;  %v283_v12 = vrot.slane %v266_v2, 1 }
  0xb7   :  { %v229_v6 = vadd.f32 %v228_v4, %v200_v3 }
  0xb8   :  { %278 = vst [vmem:[#allocation2] sm:$0xfe] %v273_v5 }
  0xb9   :  { %v257_v7 = vpop.f32.mrf.mxu2 }
  0xba   :  { %v258_v0 = vadd.f32 %v257_v7, %v229_v6 }
  0xbc   :  { %v202_v8 = vpop.f32.mrf.mxu0  ;;  %v267_v9 = vmax.f32 %v258_v0, 0.0 }
  0xbd   :  { %v203_v10 = vadd.f32 %v541_v57, %v202_v8  ;;  %v231_v11 = vpop.f32.mrf.mxu1 }
  0xbe   :  { %v274_v13 = vrot.slane %v267_v9, 7  ;;  %v284_v14 = vrot.slane %v267_v9, 1  ;;  %422 = vmatmul.f32.gmra.mxu0 %v267_v9 }
  0xbf   :  { %v232_v15 = vadd.f32 %v231_v11, %v203_v10  ;;  %v310_v16 = vld [vmem:[#allocation2] sm:$0xff] }
  0xc0   :  { %v275_v17 = vsel %vm73_vm1, %v273_v5, %v274_v13  ;;  %v285_v18 = vsel %vm84_vm0, %v283_v12, %v284_v14  ;;  %289 = vst [vmem:[#allocation2 + $0x28] sm:$0x7f] %v284_v14  ;;  %390 = vmatmul.f32.vlgmr.msra.gmra.mxu3 %v310_v16 }
  0xc1   :  { %v260_v19 = vpop.f32.mrf.mxu2  ;;  %448 = vmatmul.f32.vlgmr.msrb.gmra.mxu1 %v285_v18 }
  0xc2   :  { %v261_v20 = vadd.f32 %v260_v19, %v232_v15 }
  0xc4   :  { %v205_v21 = vpop.f32.mrf.mxu0  ;;  %v268_v22 = vmax.f32 %v261_v20, 0.0 }
  0xc5   :  { %v206_v23 = vadd.f32 %v541_v57, %v205_v21  ;;  %v234_v24 = vpop.f32.mrf.mxu1 }
  0xc6   :  { %v293_v25 = vrot.slane %v268_v22, 7  ;;  %425 = vmatmul.f32.vlgmr.msrb.gmra.mxu2 %v268_v22  ;;  %v303_v33 = vrot.slane %v268_v22, 1 }
  0xc7   :  { %v235_v26 = vadd.f32 %v234_v24, %v206_v23  ;;  %v315_v27 = vld [vmem:[#allocation2 + $0x28] sm:$0xff] }
  0xc8   :  { %298 = vst [vmem:[#allocation2 + $0x30] sm:$0xfe] %v293_v25  ;;  %393 = vmatmul.f32.gmra.mxu3 %v275_v17 }
  0xc9   :  { %v263_v28 = vpop.f32.mrf.mxu2  ;;  %451 = vmatmul.f32.gmra.mxu1 %v315_v27 }
  0xca   :  { %v264_v31 = vadd.f32 %v263_v28, %v235_v26 }
  0xcc   :  { %v269_v32 = vmax.f32 %v264_v31, 0.0 }
  0xce   :  { %v294_v34 = vrot.slane %v269_v32, 7  ;;  %v304_v35 = vrot.slane %v269_v32, 1  ;;  %428 = vmatmul.f32.gmra.mxu2 %v269_v32 }
  0xcf   :  { %v316_v38 = vld [vmem:[#allocation2 + $0x30] sm:$0xff] }
  0xd0   :  { %v295_v39 = vsel %vm73_vm1, %v293_v25, %v294_v34  ;;  %v305_v40 = vsel %vm84_vm0, %v303_v33, %v304_v35  ;;  %309 = vst [vmem:[#allocation2 + $0x58] sm:$0x7f] %v304_v35  ;;  %396 = vmatmul.f32.gmra.mxu3 %v316_v38 }
  0xd7   :  { %v321_v41 = vld [vmem:[#allocation2 + $0x58] sm:$0xff] }
  0xd8   :  { %399 = vmatmul.f32.gmra.mxu3 %v295_v39 }
  0xe0   :  { %454 = vmatmul.f32.vlgmr.msrb.gmra.mxu3 %v305_v40 }
  0xe8   :  { %457 = vmatmul.f32.gmra.mxu3 %v321_v41 }
 0x133   :  { %v420_v43 = vpop.f32.mrf.mxu0 }
 0x13b   :  { %v423_v53 = vpop.f32.mrf.mxu0 }
 0x13e   :  { %v449_v46 = vpop.f32.mrf.mxu1 }
 0x143   :  { %v391_v44 = vpop.f32.mrf.mxu3 }
 0x144   :  { %v392_v45 = vadd.f32 %v542_v42, %v391_v44 }
 0x146   :  { %v421_v47 = vadd.f32 %v420_v43, %v392_v45  ;;  %v452_v56 = vpop.f32.mrf.mxu1 }
 0x148   :  { %v450_v48 = vadd.f32 %v449_v46, %v421_v47 }
 0x149   :  { %v426_v1 = vpop.f32.mrf.mxu2 }
 0x14a   :  { %v461_v49 = vmax.f32 %v450_v48, 0.0 }
 0x14b   :  { %v394_v50 = vpop.f32.mrf.mxu3 }
 0x14c   :  { %v467_v51 = vadd.f32 %v461_v49, %v704_v29  ;;  %v395_v52 = vadd.f32 %v542_v42, %v394_v50 }
 0x14e   :  { %v469_v54 = vmax.f32 %v467_v51, 0.0  ;;  %v424_v55 = vadd.f32 %v423_v53, %v395_v52 }
 0x150   :  { %471 = vst [vmem:[#allocation9] sm:$0xff] %v469_v54  ;;  %v453_v57 = vadd.f32 %v452_v56, %v424_v55 }
 0x151   :  { %v429_v7 = vpop.f32.mrf.mxu2 }
 0x152   :  { %v462_v58 = vmax.f32 %v453_v57, 0.0 }
 0x153   :  { %v397_v59 = vpop.f32.mrf.mxu3 }
 0x154   :  { %v468_v60 = vadd.f32 %v462_v58, %v706_v30  ;;  %v398_v63 = vadd.f32 %v542_v42, %v397_v59 }
 0x156   :  { %v470_v61 = vmax.f32 %v468_v60, 0.0  ;;  %v427_v2 = vadd.f32 %v426_v1, %v398_v63 }
 0x158   :  { %472 = vst [vmem:[#allocation9 + $0x8] sm:$0xff] %v470_v61 }
 0x15b   :  { %v400_v62 = vpop.f32.mrf.mxu3 }
 0x15c   :  { %v401_v29 = vadd.f32 %v542_v42, %v400_v62 }
 0x15e   :  { %v430_v8 = vadd.f32 %v429_v7, %v401_v29 }
 0x163   :  { %v455_v3 = vpop.f32.mrf.mxu3 }
 0x164   :  { %v456_v4 = vadd.f32 %v455_v3, %v427_v2 }
 0x166   :  { %v463_v5 = vmax.f32 %v456_v4, 0.0 }
 0x168   :  { %v475_v6 = vadd.f32 %v463_v5, %v710_v36 }
 0x16a   :  { %v477_v0 = vmax.f32 %v475_v6, 0.0 }
 0x16b   :  { %v458_v9 = vpop.f32.mrf.mxu3 }
 0x16c   :  { %480 = vst [vmem:[#allocation9 + $0x10] sm:$0xff] %v477_v0  ;;  %v459_v10 = vadd.f32 %v458_v9, %v430_v8 }
 0x16e   :  { %v464_v11 = vmax.f32 %v459_v10, 0.0 }
 0x170   :  { %v476_v30 = vadd.f32 %v464_v11, %v712_v37 }
 0x172   :  { %v478_v12 = vmax.f32 %v476_v30, 0.0 }
 0x174   :  { %481 = vst [vmem:[#allocation9 + $0x18] sm:$0xff] %v478_v12 }
 0x175   :  { %494 = dma.vmem_to_hbm [thread:$0]  %s487_s10, 512, %s489_s13, [#allocation5], %s646_s26, %s646_s26, %s647_s27  }
 0x176   :  { %643 = dma.done.wait [#allocation5], 512  }
 0x177   :  { %644 = vsyncadd [#allocation5], 4294966784 }
 0x178   :  { %499 = vsyncpa [#allocation4], 1 }
 0x179   :  { %500 = vsyncpa [#allocation7], 1 }
 0x17a   :  { %501 = vsyncpa [#allocation5], 1 }

// kernel: tpu_custom_call.1
= control target key start
LH: loop header
LB: loop body
LE: loop exit
PB: predicated region body
PF: predicated region fallthrough
CT: control target
= control target key end

     0   :  { %10 = vsyncpa [#allocation4], 0  ;;  %s791_s0 = inlined_call_operand.hbm [shape: f32[2,16,128], index: 0, kind: input, shape index: {}]   ;;  %s792_s1 = inlined_call_operand.hbm [shape: f32[384,128], index: 1, kind: input, shape index: {}]   ;;  %s793_s2 = inlined_call_operand.vmem [shape: f32[1,128], index: 2, kind: input, shape index: {}]   ;;  %s794_s3 = inlined_call_operand.hbm [shape: f32[384,128], index: 3, kind: input, shape index: {}]   ;;  %s795_s4 = inlined_call_operand.vmem [shape: f32[1,128], index: 4, kind: input, shape index: {}]   ;;  %s796_s5 = inlined_call_operand.hbm [shape: f32[2,16,128], index: 5, kind: output, shape index: {}]  }
   0x1   :  { %11 = vsyncpa [#allocation7], 0 }
   0x2   :  { %12 = vsyncpa [#allocation5], 0  ;;  %s30_s20 = sshll.u32 %s792_s1, 4  ;;  %s645_s21 = smov [#allocation6]   ;;  %s31_s20 = int_to_ptr.hbm [resolvable:$true] %s30_s20 }
   0x3   :  { %s32_s22 = sshll.u32 %s645_s21, 4  ;;  %s17_s25 = sshll.u32 %s791_s0, 4  ;;  %s33_s22 = int_to_ptr.vmem [resolvable:$true] %s32_s22  ;;  %s18_s25 = int_to_ptr.hbm [resolvable:$true] %s17_s25 }
   0x4   :  { %s646_s26 = smov 128   ;;  %s647_s27 = smov 8  }
   0x5   :  { %38 = dma.hbm_to_vmem [thread:$0]  %s31_s20, 6144, %s33_s22, [#allocation7], %s646_s26, %s646_s26, %s647_s27  }
   0x6   :  { %s648_s28 = smov [#allocation3]   ;;  %s45_s1 = sshll.u32 %s794_s3, 4  ;;  %s46_s1 = int_to_ptr.hbm [resolvable:$true] %s45_s1 }
   0x7   :  { %s19_s29 = sshll.u32 %s648_s28, 4  ;;  %s649_s0 = smov [#allocation8]   ;;  %s20_s29 = int_to_ptr.vmem [resolvable:$true] %s19_s29 }
   0x8   :  { %25 = dma.hbm_to_vmem [thread:$0]  %s18_s25, 512, %s20_s29, [#allocation4], %s646_s26, %s646_s26, %s647_s27  }
   0x9   :  { %s47_s7 = sshll.u32 %s649_s0, 4  ;;  %s48_s7 = int_to_ptr.vmem [resolvable:$true] %s47_s7 }
   0xa   :  { %53 = dma.hbm_to_vmem [thread:$0]  %s46_s1, 6144, %s48_s7, [#allocation7], %s646_s26, %s646_s26, %s647_s27  }
   0xb   :  { %639 = dma.done.wait [#allocation4], 512  }
   0xc   :  { %640 = vsyncadd [#allocation4], 4294966784 }
   0xd   :  { %641 = dma.done.wait [#allocation7], 12288  }
   0xe   :  { %642 = vsyncadd [#allocation7], 4294955008  ;;  %v650_v0 = vmov 0.0   ;;  %v174_v1 = vld [vmem:[#allocation6 + $0x178] sm:$0xff]  ;;  %v173_v3 = vld [vmem:[#allocation6 + $0x170] sm:$0xff]  ;;  %vm84_vm0 = vcmask 1046528  }
   0xf   :  { %70 = vst [vmem:[#allocation2] sm:$0x1] %v650_v0  ;;  %v142_v2 = vld [vmem:[#allocation6 + $0x78] sm:$0xff]  ;;  %237 = vmatpush.msra.mxu2 %v174_v1  ;;  %v141_v4 = vld [vmem:[#allocation6 + $0x70] sm:$0xff]  ;;  %v172_v6 = vld [vmem:[#allocation6 + $0x168] sm:$0xff]  ;;  %vm73_vm1 = vcmask 1040384  }
  0x10   :  { %83 = vst [vmem:[#allocation2 + $0x2f] sm:$0x1] %v650_v0  ;;  %179 = vmatpush.msra.mxu0 %v142_v2  ;;  %v158_v5 = vld [vmem:[#allocation6 + $0xf8] sm:$0xff]  ;;  %v140_v7 = vld [vmem:[#allocation6 + $0x68] sm:$0xff]  ;;  %v157_v8 = vld [vmem:[#allocation6 + $0xf0] sm:$0xff]  ;;  %s488_s13 = sshll.u32 %s796_s5, 4  ;;  %s489_s13 = int_to_ptr.hbm [resolvable:$true] %s488_s13 }
  0x11   :  { %95 = vst [vmem:[#allocation2 + $0x30] sm:$0x1] %v650_v0  ;;  %208 = vmatpush.msra.mxu1 %v158_v5  ;;  %238 = vmatpush.msra.mxu2 %v173_v3  ;;  %v156_v9 = vld [vmem:[#allocation6 + $0xe8] sm:$0xff]  ;;  %v171_v10 = vld [vmem:[#allocation6 + $0x160] sm:$0xff]  ;;  %v170_v13 = vld [vmem:[#allocation6 + $0x158] sm:$0xff] }
  0x12   :  { %107 = vst [vmem:[#allocation2 + $0x5f] sm:$0x1] %v650_v0  ;;  %180 = vmatpush.msra.mxu0 %v141_v4  ;;  %v139_v11 = vld [vmem:[#allocation6 + $0x60] sm:$0xff]  ;;  %v138_v14 = vld [vmem:[#allocation6 + $0x58] sm:$0xff]  ;;  %v169_v16 = vld [vmem:[#allocation6 + $0x150] sm:$0xff] }
  0x13   :  { %209 = vmatpush.msra.mxu1 %v157_v8  ;;  %239 = vmatpush.msra.mxu2 %v172_v6  ;;  %v155_v12 = vld [vmem:[#allocation6 + $0xe0] sm:$0xff]  ;;  %v154_v15 = vld [vmem:[#allocation6 + $0xd8] sm:$0xff]  ;;  %v137_v17 = vld [vmem:[#allocation6 + $0x50] sm:$0xff] }
  0x14   :  { %181 = vmatpush.msra.mxu0 %v140_v7  ;;  %v153_v18 = vld [vmem:[#allocation6 + $0xd0] sm:$0xff]  ;;  %v168_v19 = vld [vmem:[#allocation6 + $0x148] sm:$0xff]  ;;  %v167_v22 = vld [vmem:[#allocation6 + $0x140] sm:$0xff] }
  0x15   :  { %210 = vmatpush.msra.mxu1 %v156_v9  ;;  %240 = vmatpush.msra.mxu2 %v171_v10  ;;  %v136_v20 = vld [vmem:[#allocation6 + $0x48] sm:$0xff]  ;;  %v135_v23 = vld [vmem:[#allocation6 + $0x40] sm:$0xff]  ;;  %v166_v25 = vld [vmem:[#allocation6 + $0x138] sm:$0xff] }
  0x16   :  { %182 = vmatpush.msra.mxu0 %v139_v11  ;;  %v152_v21 = vld [vmem:[#allocation6 + $0xc8] sm:$0xff]  ;;  %v151_v24 = vld [vmem:[#allocation6 + $0xc0] sm:$0xff]  ;;  %v134_v26 = vld [vmem:[#allocation6 + $0x38] sm:$0xff] }
  0x17   :  { %211 = vmatpush.msra.mxu1 %v155_v12  ;;  %241 = vmatpush.msra.mxu2 %v170_v13  ;;  %v165_v27 = vld [vmem:[#allocation6 + $0x130] sm:$0xff]  ;;  %v150_v28 = vld [vmem:[#allocation6 + $0xb8] sm:$0xff]  ;;  %v704_v29 = vld [vmem:[#allocation3] sm:$0xff] }
  0x18   :  { %183 = vmatpush.msra.mxu0 %v138_v14  ;;  %v706_v30 = vld [vmem:[#allocation3 + $0x8] sm:$0xff]  ;;  %v133_v31 = vld [vmem:[#allocation6 + $0x30] sm:$0xff]  ;;  %v74_v35 = vrot.slane %v704_v29, 7  ;;  %v712_v37 = vld [vmem:[#allocation3 + $0x18] sm:$0xff]  ;;  %v85_v52 = vrot.slane %v704_v29, 1 }
  0x19   :  { %212 = vmatpush.msra.mxu1 %v154_v15  ;;  %242 = vmatpush.msra.mxu2 %v169_v16  ;;  %v164_v32 = vld [vmem:[#allocation6 + $0x128] sm:$0xff]  ;;  %v149_v33 = vld [vmem:[#allocation6 + $0xb0] sm:$0xff]  ;;  %v86_v34 = vrot.slane %v706_v30, 1  ;;  %v109_v39 = vrot.slane %v712_v37, 1  ;;  %v163_v42 = vld [vmem:[#allocation6 + $0x120] sm:$0xff]  ;;  %v75_v6 = vrot.slane %v706_v30, 7 }
  0x1a   :  { %184 = vmatpush.msra.mxu0 %v137_v17  ;;  %v710_v36 = vld [vmem:[#allocation3 + $0x10] sm:$0xff]  ;;  %v132_v38 = vld [vmem:[#allocation6 + $0x28] sm:$0xff]  ;;  %79 = vst [vmem:[#allocation2] sm:$0xfe] %v74_v35  ;;  %v131_v43 = vld [vmem:[#allocation6 + $0x20] sm:$0xff] }
  0x1b   :  { %213 = vmatpush.msra.mxu1 %v153_v18  ;;  %243 = vmatpush.msra.mxu2 %v168_v19  ;;  %91 = vst [vmem:[#allocation2 + $0x28] sm:$0x7f] %v86_v34  ;;  %v148_v40 = vld [vmem:[#allocation6 + $0xa8] sm:$0xff]  ;;  %v98_v41 = vrot.slane %v710_v36, 7  ;;  %v147_v44 = vld [vmem:[#allocation6 + $0xa0] sm:$0xff]  ;;  %v162_v45 = vld [vmem:[#allocation6 + $0x118] sm:$0xff]  ;;  %v87_v63 = vsel %vm84_vm0, %v85_v52, %v86_v34  ;;  %v76_v11 = vsel %vm73_vm1, %v74_v35, %v75_v6 }
  0x1c   :  { %185 = vmatpush.msra.mxu0 %v136_v20  ;;  %114 = vst [vmem:[#allocation2 + $0x58] sm:$0x7f] %v109_v39  ;;  %v130_v46 = vld [vmem:[#allocation6 + $0x18] sm:$0xff]  ;;  %v161_v48 = vld [vmem:[#allocation6 + $0x110] sm:$0xff]  ;;  %v160_v50 = vld [vmem:[#allocation6 + $0x108] sm:$0xff]  ;;  %v108_v15 = vrot.slane %v710_v36, 1 }
  0x1d   :  { %214 = vmatpush.msra.mxu1 %v152_v21  ;;  %244 = vmatpush.msra.mxu2 %v167_v22  ;;  %103 = vst [vmem:[#allocation2 + $0x30] sm:$0xfe] %v98_v41  ;;  %v146_v47 = vld [vmem:[#allocation6 + $0x98] sm:$0xff]  ;;  %v129_v49 = vld [vmem:[#allocation6 + $0x10] sm:$0xff]  ;;  %v128_v54 = vld [vmem:[#allocation6 + $0x8] sm:$0xff]  ;;  %v99_v18 = vrot.slane %v712_v37, 7 }
  0x1e   :  { %186 = vmatpush.msra.mxu0 %v135_v23  ;;  %v145_v51 = vld [vmem:[#allocation6 + $0x90] sm:$0xff]  ;;  %v337_v56 = vld [vmem:[#allocation8 + $0x78] sm:$0xff]  ;;  %v144_v57 = vld [vmem:[#allocation6 + $0x88] sm:$0xff]  ;;  %v110_v17 = vsel %vm84_vm0, %v108_v15, %v109_v39 }
  0x1f   :  { %215 = vmatpush.msra.mxu1 %v151_v24  ;;  %245 = vmatpush.msra.mxu2 %v166_v25  ;;  %v336_v59 = vld [vmem:[#allocation8 + $0x70] sm:$0xff]  ;;  %v159_v60 = vld [vmem:[#allocation6 + $0x100] sm:$0xff]  ;;  %v353_v2 = vld [vmem:[#allocation8 + $0xf8] sm:$0xff]  ;;  %v100_v19 = vsel %vm73_vm1, %v98_v41, %v99_v18 }
  0x20   :  { %187 = vmatpush.msra.mxu0 %v134_v26  ;;  %v127_v61 = vld [vmem:[#allocation6] sm:$0xff]  ;;  %374 = vmatpush.msra.mxu3 %v337_v56  ;;  %v335_v3 = vld [vmem:[#allocation8 + $0x68] sm:$0xff]  ;;  %v352_v4 = vld [vmem:[#allocation8 + $0xf0] sm:$0xff] }
  0x21   :  { %216 = vmatpush.msra.mxu1 %v150_v28  ;;  %246 = vmatpush.msra.mxu2 %v165_v27  ;;  %v115_v55 = vld [vmem:[#allocation2] sm:$0xff]  ;;  %v730_v5 = vld [vmem:[#allocation8 + $0x178] sm:$0xff]  ;;  %v734_v8 = vld [vmem:[#allocation8 + $0x170] sm:$0xff] }
  0x22   :  { %188 = vmatpush.msra.mxu0 %v133_v31  ;;  %v120_v53 = vld [vmem:[#allocation2 + $0x28] sm:$0xff]  ;;  %270 = vst [vmem:[#allocation2] sm:$0x1] %v650_v0  ;;  %v143_v1 = vld [vmem:[#allocation6 + $0x80] sm:$0xff]  ;;  %375 = vmatpush.msra.mxu3 %v336_v59  ;;  %v333_v9 = vld [vmem:[#allocation8 + $0x58] sm:$0xff] }
  0x23   :  { %217 = vmatpush.msra.mxu1 %v149_v33  ;;  %247 = vmatpush.msra.mxu2 %v164_v32  ;;  %282 = vst [vmem:[#allocation2 + $0x2f] sm:$0x1] %v650_v0  ;;  %v725_v58 = vld [vmem:[#allocation2 + $0x58] sm:$0xff]  ;;  %v334_v7 = vld [vmem:[#allocation8 + $0x60] sm:$0xff]  ;;  %v332_v13 = vld [vmem:[#allocation8 + $0x50] sm:$0xff] }
  0x24   :  { %189 = vmatpush.msra.mxu0 %v132_v38  ;;  %v121_v62 = vld [vmem:[#allocation2 + $0x30] sm:$0xff]  ;;  %302 = vst [vmem:[#allocation2 + $0x5f] sm:$0x1] %v650_v0  ;;  %376 = vmatpush.msra.mxu3 %v335_v3  ;;  %v350_v10 = vld [vmem:[#allocation8 + $0xe0] sm:$0xff]  ;;  %v349_v12 = vld [vmem:[#allocation8 + $0xd8] sm:$0xff] }
  0x25   :  { %218 = vmatpush.msra.mxu1 %v148_v40  ;;  %248 = vmatpush.msra.mxu2 %v163_v42  ;;  %290 = vst [vmem:[#allocation2 + $0x30] sm:$0x1] %v650_v0  ;;  %v351_v0 = vld [vmem:[#allocation8 + $0xe8] sm:$0xff]  ;;  %v348_v14 = vld [vmem:[#allocation8 + $0xd0] sm:$0xff]  ;;  %v346_v20 = vld [vmem:[#allocation8 + $0xc0] sm:$0xff] }
  0x26   :  { %190 = vmatpush.msra.mxu0 %v131_v43  ;;  %377 = vmatpush.msra.mxu3 %v334_v7  ;;  %v347_v16 = vld [vmem:[#allocation8 + $0xc8] sm:$0xff]  ;;  %v345_v22 = vld [vmem:[#allocation8 + $0xb8] sm:$0xff]  ;;  %v756_v23 = vld [vmem:[#allocation8 + $0x160] sm:$0xff] }
  0x27   :  { %219 = vmatpush.msra.mxu1 %v147_v44  ;;  %249 = vmatpush.msra.mxu2 %v162_v45  ;;  %v753_v21 = vld [vmem:[#allocation8 + $0x168] sm:$0xff]  ;;  %v344_v24 = vld [vmem:[#allocation8 + $0xb0] sm:$0xff]  ;;  %v759_v25 = vld [vmem:[#allocation8 + $0x158] sm:$0xff] }
  0x28   :  { %191 = vmatpush.msra.mxu0 %v130_v46  ;;  %378 = vmatpush.msra.mxu3 %v333_v9  ;;  %v343_v26 = vld [vmem:[#allocation8 + $0xa8] sm:$0xff]  ;;  %v762_v27 = vld [vmem:[#allocation8 + $0x150] sm:$0xff]  ;;  %v342_v31 = vld [vmem:[#allocation8 + $0xa0] sm:$0xff] }
  0x29   :  { %220 = vmatpush.msra.mxu1 %v146_v47  ;;  %250 = vmatpush.msra.mxu2 %v161_v48  ;;  %v331_v28 = vld [vmem:[#allocation8 + $0x48] sm:$0xff]  ;;  %v330_v33 = vld [vmem:[#allocation8 + $0x40] sm:$0xff]  ;;  %v341_v34 = vld [vmem:[#allocation8 + $0x98] sm:$0xff] }
  0x2a   :  { %192 = vmatpush.msra.mxu0 %v129_v49  ;;  %379 = vmatpush.msra.mxu3 %v332_v13  ;;  %v363_v32 = vld [vmem:[#allocation8 + $0x148] sm:$0xff]  ;;  %v362_v35 = vld [vmem:[#allocation8 + $0x140] sm:$0xff]  ;;  %v329_v38 = vld [vmem:[#allocation8 + $0x38] sm:$0xff] }
  0x2b   :  { %221 = vmatpush.msra.mxu1 %v145_v51  ;;  %251 = vmatpush.msra.mxu2 %v160_v50  ;;  %v340_v39 = vld [vmem:[#allocation8 + $0x90] sm:$0xff]  ;;  %v361_v41 = vld [vmem:[#allocation8 + $0x138] sm:$0xff]  ;;  %v339_v42 = vld [vmem:[#allocation8 + $0x88] sm:$0xff] }
  0x2c   :  { %193 = vmatpush.msra.mxu0 %v128_v54  ;;  %380 = vmatpush.msra.mxu3 %v331_v28  ;;  %v328_v40 = vld [vmem:[#allocation8 + $0x30] sm:$0xff]  ;;  %v327_v43 = vld [vmem:[#allocation8 + $0x28] sm:$0xff]  ;;  %v338_v45 = vld [vmem:[#allocation8 + $0x80] sm:$0xff] }
  0x2d   :  { %222 = vmatpush.msra.mxu1 %v144_v57  ;;  %252 = vmatpush.msra.mxu2 %v159_v60  ;;  %v360_v44 = vld [vmem:[#allocation8 + $0x130] sm:$0xff]  ;;  %v326_v46 = vld [vmem:[#allocation8 + $0x20] sm:$0xff]  ;;  %v359_v47 = vld [vmem:[#allocation8 + $0x128] sm:$0xff] }
  0x2e   :  { %194 = vmatpush.msra.mxu0 %v127_v61  ;;  %253 = vmatmul.f32.vlgmr.msra.gmra.mxu2 %v87_v63  ;;  %v358_v48 = vld [vmem:[#allocation8 + $0x120] sm:$0xff]  ;;  %v325_v49 = vld [vmem:[#allocation8 + $0x18] sm:$0xff]  ;;  %v324_v51 = vld [vmem:[#allocation8 + $0x10] sm:$0xff] }
  0x2f   :  { %195 = vmatmul.f32.vlgmr.msra.gmra.mxu0 %v115_v55  ;;  %223 = vmatpush.msra.mxu1 %v143_v1  ;;  %v357_v50 = vld [vmem:[#allocation8 + $0x118] sm:$0xff]  ;;  %v356_v52 = vld [vmem:[#allocation8 + $0x110] sm:$0xff]  ;;  %v355_v54 = vld [vmem:[#allocation8 + $0x108] sm:$0xff] }
  0x30   :  { %403 = vmatpush.msrb.mxu0 %v353_v2  ;;  %224 = vmatmul.f32.vlgmr.msra.gmra.mxu1 %v704_v29  ;;  %v322_v55 = vld [vmem:[#allocation8] sm:$0xff] }
  0x31   :  { %432 = vmatpush.msrb.mxu1 %v730_v5  ;;  %502 = vmatpush.msrb.mxu2 %v353_v2  ;;  %v354_v56 = vld [vmem:[#allocation8 + $0x100] sm:$0xff] }
  0x32   :  { %404 = vmatpush.msrb.mxu0 %v352_v4  ;;  %381 = vmatpush.msra.mxu3 %v330_v33  ;;  %v541_v57 = vld [vmem:[%s793_s2] ss:$0 sm:$0xff] }
  0x33   :  { %433 = vmatpush.msrb.mxu1 %v734_v8  ;;  %503 = vmatpush.msrb.mxu2 %v352_v4 }
  0x34   :  { %405 = vmatpush.msrb.mxu0 %v351_v0  ;;  %382 = vmatpush.msra.mxu3 %v329_v38 }
  0x35   :  { %504 = vmatpush.msrb.mxu2 %v351_v0  ;;  %434 = vmatpush.msrb.mxu1 %v753_v21 }
  0x36   :  { %406 = vmatpush.msrb.mxu0 %v350_v10  ;;  %256 = vmatmul.f32.gmra.mxu2 %v120_v53  ;;  %v323_v53 = vld [vmem:[#allocation8 + $0x8] sm:$0xff] }
  0x37   :  { %198 = vmatmul.f32.gmra.mxu0 %v76_v11  ;;  %505 = vmatpush.msrb.mxu2 %v350_v10 }
  0x38   :  { %407 = vmatpush.msrb.mxu0 %v349_v12  ;;  %227 = vmatmul.f32.gmra.mxu1 %v706_v30 }
  0x39   :  { %506 = vmatpush.msrb.mxu2 %v349_v12  ;;  %435 = vmatpush.msrb.mxu1 %v756_v23 }
  0x3a   :  { %408 = vmatpush.msrb.mxu0 %v348_v14  ;;  %383 = vmatpush.msra.mxu3 %v328_v40 }
  0x3b   :  { %507 = vmatpush.msrb.mxu2 %v348_v14  ;;  %436 = vmatpush.msrb.mxu1 %v759_v25 }
  0x3c   :  { %409 = vmatpush.msrb.mxu0 %v347_v16  ;;  %384 = vmatpush.msra.mxu3 %v327_v43 }
  0x3d   :  { %508 = vmatpush.msrb.mxu2 %v347_v16  ;;  %437 = vmatpush.msrb.mxu1 %v762_v27 }
  0x3e   :  { %259 = vmatmul.f32.gmra.mxu2 %v110_v17  ;;  %410 = vmatpush.msrb.mxu0 %v346_v20 }
  0x3f   :  { %201 = vmatmul.f32.gmra.mxu0 %v121_v62  ;;  %509 = vmatpush.msrb.mxu2 %v346_v20 }
  0x40   :  { %230 = vmatmul.f32.gmra.mxu1 %v710_v36  ;;  %411 = vmatpush.msrb.mxu0 %v345_v22 }
  0x41   :  { %510 = vmatpush.msrb.mxu2 %v345_v22  ;;  %438 = vmatpush.msrb.mxu1 %v363_v32 }
  0x42   :  { %412 = vmatpush.msrb.mxu0 %v344_v24  ;;  %385 = vmatpush.msra.mxu3 %v326_v46 }
  0x43   :  { %511 = vmatpush.msrb.mxu2 %v344_v24  ;;  %439 = vmatpush.msrb.mxu1 %v362_v35 }
  0x44   :  { %413 = vmatpush.msrb.mxu0 %v343_v26  ;;  %386 = vmatpush.msra.mxu3 %v325_v49 }
  0x45   :  { %512 = vmatpush.msrb.mxu2 %v343_v26  ;;  %440 = vmatpush.msrb.mxu1 %v361_v41 }
  0x46   :  { %262 = vmatmul.f32.gmra.mxu2 %v725_v58  ;;  %414 = vmatpush.msrb.mxu0 %v342_v31 }
  0x47   :  { %204 = vmatmul.f32.gmra.mxu0 %v100_v19  ;;  %513 = vmatpush.msrb.mxu2 %v342_v31 }
  0x48   :  { %233 = vmatmul.f32.gmra.mxu1 %v712_v37  ;;  %415 = vmatpush.msrb.mxu0 %v341_v34 }
  0x49   :  { %514 = vmatpush.msrb.mxu2 %v341_v34  ;;  %441 = vmatpush.msrb.mxu1 %v360_v44 }
  0x4a   :  { %416 = vmatpush.msrb.mxu0 %v340_v39  ;;  %387 = vmatpush.msra.mxu3 %v324_v51 }
  0x4b   :  { %515 = vmatpush.msrb.mxu2 %v340_v39  ;;  %442 = vmatpush.msrb.mxu1 %v359_v47 }
  0x4c   :  { %417 = vmatpush.msrb.mxu0 %v339_v42  ;;  %388 = vmatpush.msra.mxu3 %v323_v53 }
  0x4d   :  { %516 = vmatpush.msrb.mxu2 %v339_v42  ;;  %443 = vmatpush.msrb.mxu1 %v358_v48  ;;  %v542_v42 = vld [vmem:[%s795_s4] ss:$0 sm:$0xff]  ;;  %s651_s4 = smov [#allocation9]  }
  0x4e   :  { %418 = vmatpush.msrb.mxu0 %v338_v45  ;;  %389 = vmatpush.msra.mxu3 %v322_v55  ;;  %s486_s10 = sshll.u32 %s651_s4, 4  ;;  %s487_s10 = int_to_ptr.vmem [resolvable:$true] %s486_s10 }
  0x4f   :  { %517 = vmatpush.msrb.mxu2 %v338_v45  ;;  %444 = vmatpush.msrb.mxu1 %v357_v50 }
  0x50   :  { %518 = vmatpush.msrb.mxu3 %v730_v5 }
  0x51   :  { %445 = vmatpush.msrb.mxu1 %v356_v52 }
  0x52   :  { %519 = vmatpush.msrb.mxu3 %v734_v8 }
  0x53   :  { %446 = vmatpush.msrb.mxu1 %v355_v54 }
  0x54   :  { %520 = vmatpush.msrb.mxu3 %v753_v21 }
  0x55   :  { %447 = vmatpush.msrb.mxu1 %v354_v56 }
  0x56   :  { %521 = vmatpush.msrb.mxu3 %v756_v23 }
  0x58   :  { %522 = vmatpush.msrb.mxu3 %v759_v25 }
  0x5a   :  { %523 = vmatpush.msrb.mxu3 %v762_v27 }
  0x5c   :  { %524 = vmatpush.msrb.mxu3 %v363_v32 }
  0x5e   :  { %525 = vmatpush.msrb.mxu3 %v362_v35 }
  0x60   :  { %526 = vmatpush.msrb.mxu3 %v361_v41 }
  0x62   :  { %527 = vmatpush.msrb.mxu3 %v360_v44 }
  0x64   :  { %528 = vmatpush.msrb.mxu3 %v359_v47 }
  0x66   :  { %529 = vmatpush.msrb.mxu3 %v358_v48 }
  0x68   :  { %530 = vmatpush.msrb.mxu3 %v357_v50 }
  0x6a   :  { %531 = vmatpush.msrb.mxu3 %v356_v52 }
  0x6c   :  { %532 = vmatpush.msrb.mxu3 %v355_v54 }
  0x6e   :  { %533 = vmatpush.msrb.mxu3 %v354_v56 }
  0xac   :  { %v196_v58 = vpop.f32.mrf.mxu0 }
  0xad   :  { %v197_v59 = vadd.f32 %v541_v57, %v196_v58  ;;  %v225_v60 = vpop.f32.mrf.mxu1 }
  0xaf   :  { %v226_v61 = vadd.f32 %v225_v60, %v197_v59 }
  0xb1   :  { %v254_v62 = vpop.f32.mrf.mxu2 }
  0xb2   :  { %v255_v63 = vadd.f32 %v254_v62, %v226_v61 }
  0xb4   :  { %v199_v1 = vpop.f32.mrf.mxu0  ;;  %v266_v2 = vmax.f32 %v255_v63, 0.0 }
  0xb5   :  { %v200_v3 = vadd.f32 %v541_v57, %v199_v1  ;;  %v228_v4 = vpop.f32.mrf.mxu1 }
  0xb6   :  { %v273_v5 = vrot.slane %v266_v2, 7  ;;  %419 = vmatmul.f32.vlgmr.msrb.gmra.mxu0 %v266_v2  ;;  %v283_v12 = vrot.slane %v266_v2, 1 }
  0xb7   :  { %v229_v6 = vadd.f32 %v228_v4, %v200_v3 }
  0xb8   :  { %278 = vst [vmem:[#allocation2] sm:$0xfe] %v273_v5 }
  0xb9   :  { %v257_v7 = vpop.f32.mrf.mxu2 }
  0xba   :  { %v258_v0 = vadd.f32 %v257_v7, %v229_v6 }
  0xbc   :  { %v202_v8 = vpop.f32.mrf.mxu0  ;;  %v267_v9 = vmax.f32 %v258_v0, 0.0 }
  0xbd   :  { %v203_v10 = vadd.f32 %v541_v57, %v202_v8  ;;  %v231_v11 = vpop.f32.mrf.mxu1 }
  0xbe   :  { %v274_v13 = vrot.slane %v267_v9, 7  ;;  %v284_v14 = vrot.slane %v267_v9, 1  ;;  %422 = vmatmul.f32.gmra.mxu0 %v267_v9 }
  0xbf   :  { %v232_v15 = vadd.f32 %v231_v11, %v203_v10  ;;  %v310_v16 = vld [vmem:[#allocation2] sm:$0xff] }
  0xc0   :  { %v275_v17 = vsel %vm73_vm1, %v273_v5, %v274_v13  ;;  %v285_v18 = vsel %vm84_vm0, %v283_v12, %v284_v14  ;;  %289 = vst [vmem:[#allocation2 + $0x28] sm:$0x7f] %v284_v14  ;;  %390 = vmatmul.f32.vlgmr.msra.gmra.mxu3 %v310_v16 }
  0xc1   :  { %v260_v19 = vpop.f32.mrf.mxu2  ;;  %448 = vmatmul.f32.vlgmr.msrb.gmra.mxu1 %v285_v18 }
  0xc2   :  { %v261_v20 = vadd.f32 %v260_v19, %v232_v15 }
  0xc4   :  { %v205_v21 = vpop.f32.mrf.mxu0  ;;  %v268_v22 = vmax.f32 %v261_v20, 0.0 }
  0xc5   :  { %v206_v23 = vadd.f32 %v541_v57, %v205_v21  ;;  %v234_v24 = vpop.f32.mrf.mxu1 }
  0xc6   :  { %v293_v25 = vrot.slane %v268_v22, 7  ;;  %425 = vmatmul.f32.vlgmr.msrb.gmra.mxu2 %v268_v22  ;;  %v303_v33 = vrot.slane %v268_v22, 1 }
  0xc7   :  { %v235_v26 = vadd.f32 %v234_v24, %v206_v23  ;;  %v315_v27 = vld [vmem:[#allocation2 + $0x28] sm:$0xff] }
  0xc8   :  { %298 = vst [vmem:[#allocation2 + $0x30] sm:$0xfe] %v293_v25  ;;  %393 = vmatmul.f32.gmra.mxu3 %v275_v17 }
  0xc9   :  { %v263_v28 = vpop.f32.mrf.mxu2  ;;  %451 = vmatmul.f32.gmra.mxu1 %v315_v27 }
  0xca   :  { %v264_v31 = vadd.f32 %v263_v28, %v235_v26 }
  0xcc   :  { %v269_v32 = vmax.f32 %v264_v31, 0.0 }
  0xce   :  { %v294_v34 = vrot.slane %v269_v32, 7  ;;  %v304_v35 = vrot.slane %v269_v32, 1  ;;  %428 = vmatmul.f32.gmra.mxu2 %v269_v32 }
  0xcf   :  { %v316_v38 = vld [vmem:[#allocation2 + $0x30] sm:$0xff] }
  0xd0   :  { %v295_v39 = vsel %vm73_vm1, %v293_v25, %v294_v34  ;;  %v305_v40 = vsel %vm84_vm0, %v303_v33, %v304_v35  ;;  %309 = vst [vmem:[#allocation2 + $0x58] sm:$0x7f] %v304_v35  ;;  %396 = vmatmul.f32.gmra.mxu3 %v316_v38 }
  0xd7   :  { %v321_v41 = vld [vmem:[#allocation2 + $0x58] sm:$0xff] }
  0xd8   :  { %399 = vmatmul.f32.gmra.mxu3 %v295_v39 }
  0xe0   :  { %454 = vmatmul.f32.vlgmr.msrb.gmra.mxu3 %v305_v40 }
  0xe8   :  { %457 = vmatmul.f32.gmra.mxu3 %v321_v41 }
 0x133   :  { %v420_v43 = vpop.f32.mrf.mxu0 }
 0x13b   :  { %v423_v53 = vpop.f32.mrf.mxu0 }
 0x13e   :  { %v449_v46 = vpop.f32.mrf.mxu1 }
 0x143   :  { %v391_v44 = vpop.f32.mrf.mxu3 }
 0x144   :  { %v392_v45 = vadd.f32 %v542_v42, %v391_v44 }
 0x146   :  { %v421_v47 = vadd.f32 %v420_v43, %v392_v45  ;;  %v452_v56 = vpop.f32.mrf.mxu1 }
 0x148   :  { %v450_v48 = vadd.f32 %v449_v46, %v421_v47 }
 0x149   :  { %v426_v1 = vpop.f32.mrf.mxu2 }
 0x14a   :  { %v461_v49 = vmax.f32 %v450_v48, 0.0 }
 0x14b   :  { %v394_v50 = vpop.f32.mrf.mxu3 }
 0x14c   :  { %v467_v51 = vadd.f32 %v461_v49, %v704_v29  ;;  %v395_v52 = vadd.f32 %v542_v42, %v394_v50 }
 0x14e   :  { %v469_v54 = vmax.f32 %v467_v51, 0.0  ;;  %v424_v55 = vadd.f32 %v423_v53, %v395_v52 }
 0x150   :  { %471 = vst [vmem:[#allocation9] sm:$0xff] %v469_v54  ;;  %v453_v57 = vadd.f32 %v452_v56, %v424_v55 }
 0x151   :  { %v429_v7 = vpop.f32.mrf.mxu2 }
 0x152   :  { %v462_v58 = vmax.f32 %v453_v57, 0.0 }
 0x153   :  { %v397_v59 = vpop.f32.mrf.mxu3 }
 0x154   :  { %v468_v60 = vadd.f32 %v462_v58, %v706_v30  ;;  %v398_v63 = vadd.f32 %v542_v42, %v397_v59 }
 0x156   :  { %v470_v61 = vmax.f32 %v468_v60, 0.0  ;;  %v427_v2 = vadd.f32 %v426_v1, %v398_v63 }
 0x158   :  { %472 = vst [vmem:[#allocation9 + $0x8] sm:$0xff] %v470_v61 }
 0x15b   :  { %v400_v62 = vpop.f32.mrf.mxu3 }
 0x15c   :  { %v401_v29 = vadd.f32 %v542_v42, %v400_v62 }
 0x15e   :  { %v430_v8 = vadd.f32 %v429_v7, %v401_v29 }
 0x163   :  { %v455_v3 = vpop.f32.mrf.mxu3 }
 0x164   :  { %v456_v4 = vadd.f32 %v455_v3, %v427_v2 }
 0x166   :  { %v463_v5 = vmax.f32 %v456_v4, 0.0 }
 0x168   :  { %v475_v6 = vadd.f32 %v463_v5, %v710_v36 }
 0x16a   :  { %v477_v0 = vmax.f32 %v475_v6, 0.0 }
 0x16b   :  { %v458_v9 = vpop.f32.mrf.mxu3 }
 0x16c   :  { %480 = vst [vmem:[#allocation9 + $0x10] sm:$0xff] %v477_v0  ;;  %v459_v10 = vadd.f32 %v458_v9, %v430_v8 }
 0x16e   :  { %v464_v11 = vmax.f32 %v459_v10, 0.0 }
 0x170   :  { %v476_v30 = vadd.f32 %v464_v11, %v712_v37 }
 0x172   :  { %v478_v12 = vmax.f32 %v476_v30, 0.0 }
 0x174   :  { %481 = vst [vmem:[#allocation9 + $0x18] sm:$0xff] %v478_v12 }
 0x175   :  { %494 = dma.vmem_to_hbm [thread:$0]  %s487_s10, 512, %s489_s13, [#allocation5], %s646_s26, %s646_s26, %s647_s27  }
 0x176   :  { %643 = dma.done.wait [#allocation5], 512  }
 0x177   :  { %644 = vsyncadd [#allocation5], 4294966784 }
 0x178   :  { %499 = vsyncpa [#allocation4], 1 }
 0x179   :  { %500 = vsyncpa [#allocation7], 1 }
 0x17a   :  { %501 = vsyncpa [#allocation5], 1 }

</bundles_post_ra>
